<compile_context>
chip_gen: v5e
topology: v5e:2x2
jax: 0.10.0
libtpu: 0.0.40
codegen_flags: <defaults>
</compile_context>

<pallas_src>
import functools

import jax
import jax.numpy as jnp
from jax import lax
from jax.experimental import pallas as pl
from jax.experimental.pallas import tpu as pltpu


def _round_up(x, m):
    return (x + m - 1) // m * m


# ------------- conv + maxpool + relu = im2col (glue) + one Pallas kernel -------------

def _conv_pool_relu_kernel(w_ref, b_ref, cols_ref, o_ref, *, nwin):
    # w_ref:    (O, K)            bf16, resident
    # b_ref:    (O, 1)            f32,  resident
    # cols_ref: (1, nwin, K, Sp)  bf16  (nwin = pool*pool window positions)
    # o_ref:    (1, O, Sp)        f32
    acc = jnp.dot(w_ref[...], cols_ref[0, 0], preferred_element_type=jnp.float32)
    for widx in range(1, nwin):
        acc = jnp.maximum(
            acc,
            jnp.dot(w_ref[...], cols_ref[0, widx],
                    preferred_element_type=jnp.float32))
    # bias is constant over the pool window, so max(conv)+b == max(conv+b);
    # ReLU after the pool matches the module's Conv -> MaxPool -> ReLU exactly.
    o_ref[0] = jnp.maximum(acc + b_ref[...], 0.0)


def _im2col_pool_group(x, k, stride, p):
    """im2col in OIHW feature order, grouped by pool-window position.

    Returns cols of shape (B, p*p, C*k*k, Hp*Wp) where (Hp, Wp) is the pooled
    output spatial size and the leading p*p axis enumerates the pool-window
    offsets (pi, pj)."""
    B, C, H, W = x.shape
    Ho = (H - k) // stride + 1
    Wo = (W - k) // stride + 1
    cols = []
    for ki in range(k):
        for kj in range(k):
            cols.append(x[:, :, ki:ki + stride * (Ho - 1) + 1:stride,
                             kj:kj + stride * (Wo - 1) + 1:stride])
    cols = jnp.stack(cols, axis=2)                    # (B, C, k*k, Ho, Wo)
    K = C * k * k
    cols = cols.reshape(B, K, Ho, Wo)                 # feature order (c, kh, kw)
    Hp, Wp = Ho // p, Wo // p
    cols = cols.reshape(B, K, Hp, p, Wp, p)
    cols = cols.transpose(0, 3, 5, 1, 2, 4)           # (B, pi, pj, K, Hp, Wp)
    cols = cols.reshape(B, p * p, K, Hp * Wp)
    return cols, Hp, Wp


def conv_pool_relu_pallas(x, w, b, stride, pool):
    # TODO(synk): patch extraction stays as (cheap, fully fused) XLA glue in
    # front of the kernel; moving it in-kernel needs stride-2 slicing support.
    O, C, k, _ = w.shape
    B = x.shape[0]
    cols, Hp, Wp = _im2col_pool_group(x, k, stride, pool)
    K = C * k * k
    S = Hp * Wp
    Sp = S if S < 128 else _round_up(S, 128)          # lane-dense output when large
    if Sp != S:
        cols = jnp.pad(cols, ((0, 0), (0, 0), (0, 0), (0, Sp - S)))
    cols = cols.astype(jnp.bfloat16)
    w2 = w.reshape(O, K).astype(jnp.bfloat16)
    b2 = b.reshape(O, 1).astype(jnp.float32)
    nwin = pool * pool
    out = pl.pallas_call(
        functools.partial(_conv_pool_relu_kernel, nwin=nwin),
        out_shape=jax.ShapeDtypeStruct((B, O, Sp), jnp.float32),
        grid=(B,),
        in_specs=[
            pl.BlockSpec((O, K), lambda bb: (0, 0)),              # weights resident
            pl.BlockSpec((O, 1), lambda bb: (0, 0)),              # bias resident
            pl.BlockSpec((1, nwin, K, Sp), lambda bb: (bb, 0, 0, 0)),
        ],
        out_specs=pl.BlockSpec((1, O, Sp), lambda bb: (bb, 0, 0)),
        compiler_params=pltpu.CompilerParams(
            dimension_semantics=("parallel",)),
    )(w2, b2, cols)
    return out[:, :, :S].reshape(B, O, Hp, Wp)


# ------------------- affine_grid + grid_sample (STN sampler) -------------------

def _stn_sample_kernel(theta_ref, x_ref, o_ref, *, Hin, Win, Hout, Wout, C, TR):
    # theta_ref: (N, 6) in SMEM
    # x_ref:     (1, C*Hin, Win) f32 VMEM block (resident across row-block axis)
    # o_ref:     (1, C, TR*Wout) f32 dense, lane-aligned NCHW row-block
    b = pl.program_id(0)
    rb = pl.program_id(1)
    TRW = TR * Wout

    # flattened (row-in-block, col) index over the TR output rows of this block
    lin = lax.broadcasted_iota(jnp.int32, (1, TRW), 1)
    r_idx = (lin // Wout).astype(jnp.float32)                  # (1, TRW)
    w_idx = (lin % Wout).astype(jnp.float32)                   # (1, TRW)
    fi = (rb * TR).astype(jnp.float32) + r_idx                 # absolute output row

    # affine_grid base coords (align_corners=False)
    yn = (2.0 * fi + 1.0) / Hout - 1.0
    xn = (2.0 * w_idx + 1.0) / Wout - 1.0

    t00 = theta_ref[b, 0]; t01 = theta_ref[b, 1]; t02 = theta_ref[b, 2]
    t10 = theta_ref[b, 3]; t11 = theta_ref[b, 4]; t12 = theta_ref[b, 5]

    gx = t00 * xn + t01 * yn + t02                             # (1, TRW)
    gy = t10 * xn + t11 * yn + t12
    # grid_sample unnormalize (align_corners=False)
    ix = ((gx + 1.0) * Win - 1.0) * 0.5
    iy = ((gy + 1.0) * Hin - 1.0) * 0.5

    # bilinear corner indices / weights (exact f32 compares)
    x0 = jnp.floor(ix); fx = ix - x0
    y0 = jnp.floor(iy); fy = iy - y0

    # Transposed one-hot bilinear weight matrices (src index, flat output pos),
    # built by broadcasting column iotas against the row vectors.
    # Out-of-range corners are automatically zero (padding_mode='zeros').
    q = lax.broadcasted_iota(jnp.int32, (Win, 1), 0).astype(jnp.float32)
    p = lax.broadcasted_iota(jnp.int32, (Hin, 1), 0).astype(jnp.float32)
    wxT = jnp.where(q == x0, 1.0 - fx, 0.0) + jnp.where(q == x0 + 1.0, fx, 0.0)
    wyT = jnp.where(p == y0, 1.0 - fy, 0.0) + jnp.where(p == y0 + 1.0, fy, 0.0)

    # x-contraction for all channels in one f32 MXU matmul.
    img = x_ref[0]                                             # (C*Hin, Win) f32
    hm = jnp.dot(img, wxT, preferred_element_type=jnp.float32)  # (C*Hin, TRW)

    # y-contraction: per-channel VPU multiply + sublane reduce (keeps temps small).
    rows = []
    for c in range(C):
        rows.append(jnp.sum(hm[c * Hin:(c + 1) * Hin, :] * wyT,
                            axis=0, keepdims=True))            # (1, TRW)
    o_ref[0] = jnp.concatenate(rows, axis=0)                   # dense (C, TRW) store


def stn_grid_sample_pallas(x, theta, tr=48):
    N, C, H, W = x.shape
    assert (tr * W) % 128 == 0, "flattened row-block store requires TR*W % 128 == 0"
    Hp = _round_up(H, tr)
    x2 = x.reshape(N, C * H, W).astype(jnp.float32)       # pre-reshaped once in XLA
    theta2 = theta.reshape(N, 6).astype(jnp.float32)
    kernel = functools.partial(_stn_sample_kernel,
                               Hin=H, Win=W, Hout=H, Wout=W, C=C, TR=tr)
    out = pl.pallas_call(
        kernel,
        out_shape=jax.ShapeDtypeStruct((N, C, Hp * W), jnp.float32),
        grid=(N, Hp // tr),
        in_specs=[
            pl.BlockSpec(memory_space=pltpu.MemorySpace.SMEM),        # theta scalars
            pl.BlockSpec((1, C * H, W), lambda b, rb: (b, 0, 0)),     # image resident per b
        ],
        out_specs=pl.BlockSpec((1, C, tr * W), lambda b, rb: (b, 0, rb)),
        compiler_params=pltpu.CompilerParams(
            dimension_semantics=("parallel", "arbitrary"),
            vmem_limit_bytes=40 * 1024 * 1024),   # f32 temps at TR=48 exceed v5e's 16 MiB default
    )(theta2, x2)
    out = out.reshape(N, C, Hp, W)
    if Hp != H:
        out = out[:, :, :H, :]
    return out


# ------------------------------- full forward -------------------------------

def transform_net_stn_forward(x, params, num_channels):
    H, W = x.shape[-2], x.shape[-1]
    x3 = x.reshape(-1, num_channels, H, W).astype(jnp.float32)
    # localization: Conv(7,s2)->MaxPool(3,3)->ReLU and Conv(5,s2)->MaxPool(2,2)->ReLU,
    # each as ONE fused Pallas kernel.
    h = conv_pool_relu_pallas(x3, params["conv1_w"], params["conv1_b"],
                              stride=2, pool=3)                    # (N, 8, 15, 15)
    h = conv_pool_relu_pallas(h, params["conv2_w"], params["conv2_b"],
                              stride=2, pool=2)                    # (N, 10, 3, 3)
    xs = h.reshape(-1, 10 * 3 * 3)
    # fc_loc in plain XLA (a standalone pallas_call here is pure launch overhead).
    hid = jnp.maximum(xs @ params["fc1_w_t"] + params["fc1_b"], 0.0)
    theta = (hid @ params["fc2_w_t"] + params["fc2_b"]).reshape(-1, 2, 3)
    out = stn_grid_sample_pallas(x3, theta, tr=48)
    return out, theta     # module returns only the resampled x; theta kept for testing


# ----------------------------- pure-JAX references -----------------------------

def _theta_reference(x3, params):
    dn = ("NCHW", "OIHW", "NCHW")
    h = lax.conv_general_dilated(x3, params["conv1_w"], (2, 2), "VALID",
                                 dimension_numbers=dn)
    h = h + params["conv1_b"][None, :, None, None]
    h = lax.reduce_window(h, -jnp.inf, lax.max, (1, 1, 3, 3), (1, 1, 3, 3), "VALID")
    h = jnp.maximum(h, 0.0)
    h = lax.conv_general_dilated(h, params["conv2_w"], (2, 2), "VALID",
                                 dimension_numbers=dn)
    h = h + params["conv2_b"][None, :, None, None]
    h = lax.reduce_window(h, -jnp.inf, lax.max, (1, 1, 2, 2), (1, 1, 2, 2), "VALID")
    h = jnp.maximum(h, 0.0)
    xs = h.reshape(-1, 90)
    hid = jnp.maximum(xs @ params["fc1_w_t"] + params["fc1_b"], 0.0)
    return (hid @ params["fc2_w_t"] + params["fc2_b"]).reshape(-1, 2, 3)


def _grid_sample_reference(x, theta):
    N, C, H, W = x.shape
    xn = ((2.0 * jnp.arange(W) + 1.0) / W - 1.0)[None, :]
    yn = ((2.0 * jnp.arange(H) + 1.0) / H - 1.0)[:, None]
    gx = theta[:, 0, 0, None, None] * xn + theta[:, 0, 1, None, None] * yn + theta[:, 0, 2, None, None]
    gy = theta[:, 1, 0, None, None] * xn + theta[:, 1, 1, None, None] * yn + theta[:, 1, 2, None, None]
    ix = ((gx + 1.0) * W - 1.0) * 0.5
    iy = ((gy + 1.0) * H - 1.0) * 0.5
    x0 = jnp.floor(ix)
    y0 = jnp.floor(iy)
    fx = ix - x0
    fy = iy - y0

    def corner(dx, dy):
        cx = x0 + dx
        cy = y0 + dy
        valid = (cx >= 0) & (cx <= W - 1) & (cy >= 0) & (cy <= H - 1)
        cxi = jnp.clip(cx, 0, W - 1).astype(jnp.int32)
        cyi = jnp.clip(cy, 0, H - 1).astype(jnp.int32)
        v = jax.vmap(lambda img, yy, xx: img[:, yy, xx])(x, cyi, cxi)   # (N, C, H, W)
        wx = (1.0 - fx) if dx == 0 else fx
        wy = (1.0 - fy) if dy == 0 else fy
        w = jnp.where(valid, wx * wy, 0.0)
        return v * w[:, None, :, :]

    return corner(0, 0) + corner(1, 0) + corner(0, 1) + corner(1, 1)


if __name__ == "__main__":
    num_channels = 3
    batch = 2
    # Smallest spatial family for which the localization head produces the
    # 10*3*3 features that fc_loc requires: 96 -> 45 -> 15 -> 6 -> 3.
    H = W = 96

    root = jax.random.PRNGKey(0)
    kx, k1, k2, k3, k4, k5, k6, k7 = jax.random.split(root, 8)
    x = jax.random.normal(kx, (batch, num_channels, H, W), jnp.float32)

    params = {
        "conv1_w": jax.random.normal(k1, (8, num_channels, 7, 7), jnp.float32)
                   / jnp.sqrt(num_channels * 49.0),
        "conv1_b": 0.1 * jax.random.normal(k2, (8,), jnp.float32),
        "conv2_w": jax.random.normal(k3, (10, 8, 5, 5), jnp.float32) / jnp.sqrt(8 * 25.0),
        "conv2_b": 0.1 * jax.random.normal(k4, (10,), jnp.float32),
        "fc1_w_t": (jax.random.normal(k5, (32, 90), jnp.float32) / jnp.sqrt(90.0)).T,
        "fc1_b": (0.1 * jax.random.normal(k6, (32,), jnp.float32)).reshape(1, 32),
        # NOTE: the PyTorch module zero-inits fc_loc[2].weight (theta == identity);
        # a small deterministic perturbation is used so the affine-grid / bilinear
        # sampling path is exercised non-trivially. Bias matches the module init.
        "fc2_w_t": (0.01 * jax.random.normal(k7, (6, 32), jnp.float32)).T,
        "fc2_b": jnp.array([[1.0, 0.0, 0.0, 0.0, 1.0, 0.0]], jnp.float32),
    }

    out, theta = transform_net_stn_forward(x, params, num_channels)
    out = jax.block_until_ready(out)

    assert out.shape == (batch, num_channels, H, W)
    assert bool(jnp.all(jnp.isfinite(out)))

    # Sanity checks vs. pure-JAX references.
    x3 = x.reshape(-1, num_channels, H, W)
    theta_ref = _theta_reference(x3, params)
    # theta tolerance covers the bf16 conv matmul operands (f32 accumulate).
    assert float(jnp.max(jnp.abs(theta - theta_ref))) < 2e-2
    # sampler is fully f32 -> tight tolerance (reference fed the kernel's theta).
    out_ref = _grid_sample_reference(x3, theta).reshape(-1, num_channels, H, W)
    assert float(jnp.max(jnp.abs(out - out_ref))) < 1e-3

    print("KERNEL_OK")
</pallas_src>

<mosaic_0001>
module attributes {stable_mosaic.version = 11 : i64} {
  func.func @_conv_pool_relu_kernel(%arg0: i32, %arg1: memref<8x147xbf16, #tpu.memory_space<vmem>>, %arg2: memref<8x1xf32, #tpu.memory_space<vmem>>, %arg3: memref<1x9x147x256xbf16, #tpu.memory_space<vmem>>, %arg4: memref<1x8x256xf32, #tpu.memory_space<vmem>>) attributes {dimension_semantics = [#tpu.dimension_semantics<parallel>], iteration_bounds = array<i64: 2>, scalar_prefetch = 0 : i64, scratch_operands = 0 : i64, tpu.core_type = #tpu.core_type<tc>, window_params = [{pipeline_mode = #tpu.pipeline_mode<synchronous>, transform_indices = @transform_0, window_bounds = array<i64: 8, 147>}, {pipeline_mode = #tpu.pipeline_mode<synchronous>, transform_indices = @transform_1, window_bounds = array<i64: 8, 1>}, {transform_indices = @transform_2, window_bounds = array<i64: 1, 9, 147, 256>}, {transform_indices = @transform_3, window_bounds = array<i64: 1, 8, 256>}]} {
    %c0 = arith.constant 0 : index
    %c0_0 = arith.constant 0 : index
    %0 = vector.load %arg1[%c0, %c0_0] : memref<8x147xbf16, #tpu.memory_space<vmem>>, vector<8x147xbf16>
    %c0_1 = arith.constant 0 : index
    %c0_2 = arith.constant 0 : index
    %c0_3 = arith.constant 0 : index
    %c0_4 = arith.constant 0 : index
    %1 = vector.load %arg3[%c0_1, %c0_2, %c0_3, %c0_4] : memref<1x9x147x256xbf16, #tpu.memory_space<vmem>>, vector<1x1x147x256xbf16>
    %2 = vector.shape_cast %1 : vector<1x1x147x256xbf16> to vector<147x256xbf16>
    %cst = arith.constant dense<0.000000e+00> : vector<8x256xf32>
    %3 = tpu.matmul %0, %2, %cst {dimension_numbers = #tpu.dot_dimension_numbers<[1], [0], [0], [1], [0, 0, 1, 1], [], []>} : vector<8x147xbf16>, vector<147x256xbf16>, vector<8x256xf32> -> vector<8x256xf32>
    %c0_5 = arith.constant 0 : index
    %c0_6 = arith.constant 0 : index
    %4 = vector.load %arg1[%c0_5, %c0_6] : memref<8x147xbf16, #tpu.memory_space<vmem>>, vector<8x147xbf16>
    %c0_7 = arith.constant 0 : index
    %c1 = arith.constant 1 : index
    %c0_8 = arith.constant 0 : index
    %c0_9 = arith.constant 0 : index
    %5 = vector.load %arg3[%c0_7, %c1, %c0_8, %c0_9] : memref<1x9x147x256xbf16, #tpu.memory_space<vmem>>, vector<1x1x147x256xbf16>
    %6 = vector.shape_cast %5 : vector<1x1x147x256xbf16> to vector<147x256xbf16>
    %cst_10 = arith.constant dense<0.000000e+00> : vector<8x256xf32>
    %7 = tpu.matmul %4, %6, %cst_10 {dimension_numbers = #tpu.dot_dimension_numbers<[1], [0], [0], [1], [0, 0, 1, 1], [], []>} : vector<8x147xbf16>, vector<147x256xbf16>, vector<8x256xf32> -> vector<8x256xf32>
    %8 = arith.maximumf %3, %7 : vector<8x256xf32>
    %c0_11 = arith.constant 0 : index
    %c0_12 = arith.constant 0 : index
    %9 = vector.load %arg1[%c0_11, %c0_12] : memref<8x147xbf16, #tpu.memory_space<vmem>>, vector<8x147xbf16>
    %c0_13 = arith.constant 0 : index
    %c2 = arith.constant 2 : index
    %c0_14 = arith.constant 0 : index
    %c0_15 = arith.constant 0 : index
    %10 = vector.load %arg3[%c0_13, %c2, %c0_14, %c0_15] : memref<1x9x147x256xbf16, #tpu.memory_space<vmem>>, vector<1x1x147x256xbf16>
    %11 = vector.shape_cast %10 : vector<1x1x147x256xbf16> to vector<147x256xbf16>
    %cst_16 = arith.constant dense<0.000000e+00> : vector<8x256xf32>
    %12 = tpu.matmul %9, %11, %cst_16 {dimension_numbers = #tpu.dot_dimension_numbers<[1], [0], [0], [1], [0, 0, 1, 1], [], []>} : vector<8x147xbf16>, vector<147x256xbf16>, vector<8x256xf32> -> vector<8x256xf32>
    %13 = arith.maximumf %8, %12 : vector<8x256xf32>
    %c0_17 = arith.constant 0 : index
    %c0_18 = arith.constant 0 : index
    %14 = vector.load %arg1[%c0_17, %c0_18] : memref<8x147xbf16, #tpu.memory_space<vmem>>, vector<8x147xbf16>
    %c0_19 = arith.constant 0 : index
    %c3 = arith.constant 3 : index
    %c0_20 = arith.constant 0 : index
    %c0_21 = arith.constant 0 : index
    %15 = vector.load %arg3[%c0_19, %c3, %c0_20, %c0_21] : memref<1x9x147x256xbf16, #tpu.memory_space<vmem>>, vector<1x1x147x256xbf16>
    %16 = vector.shape_cast %15 : vector<1x1x147x256xbf16> to vector<147x256xbf16>
    %cst_22 = arith.constant dense<0.000000e+00> : vector<8x256xf32>
    %17 = tpu.matmul %14, %16, %cst_22 {dimension_numbers = #tpu.dot_dimension_numbers<[1], [0], [0], [1], [0, 0, 1, 1], [], []>} : vector<8x147xbf16>, vector<147x256xbf16>, vector<8x256xf32> -> vector<8x256xf32>
    %18 = arith.maximumf %13, %17 : vector<8x256xf32>
    %c0_23 = arith.constant 0 : index
    %c0_24 = arith.constant 0 : index
    %19 = vector.load %arg1[%c0_23, %c0_24] : memref<8x147xbf16, #tpu.memory_space<vmem>>, vector<8x147xbf16>
    %c0_25 = arith.constant 0 : index
    %c4 = arith.constant 4 : index
    %c0_26 = arith.constant 0 : index
    %c0_27 = arith.constant 0 : index
    %20 = vector.load %arg3[%c0_25, %c4, %c0_26, %c0_27] : memref<1x9x147x256xbf16, #tpu.memory_space<vmem>>, vector<1x1x147x256xbf16>
    %21 = vector.shape_cast %20 : vector<1x1x147x256xbf16> to vector<147x256xbf16>
    %cst_28 = arith.constant dense<0.000000e+00> : vector<8x256xf32>
    %22 = tpu.matmul %19, %21, %cst_28 {dimension_numbers = #tpu.dot_dimension_numbers<[1], [0], [0], [1], [0, 0, 1, 1], [], []>} : vector<8x147xbf16>, vector<147x256xbf16>, vector<8x256xf32> -> vector<8x256xf32>
    %23 = arith.maximumf %18, %22 : vector<8x256xf32>
    %c0_29 = arith.constant 0 : index
    %c0_30 = arith.constant 0 : index
    %24 = vector.load %arg1[%c0_29, %c0_30] : memref<8x147xbf16, #tpu.memory_space<vmem>>, vector<8x147xbf16>
    %c0_31 = arith.constant 0 : index
    %c5 = arith.constant 5 : index
    %c0_32 = arith.constant 0 : index
    %c0_33 = arith.constant 0 : index
    %25 = vector.load %arg3[%c0_31, %c5, %c0_32, %c0_33] : memref<1x9x147x256xbf16, #tpu.memory_space<vmem>>, vector<1x1x147x256xbf16>
    %26 = vector.shape_cast %25 : vector<1x1x147x256xbf16> to vector<147x256xbf16>
    %cst_34 = arith.constant dense<0.000000e+00> : vector<8x256xf32>
    %27 = tpu.matmul %24, %26, %cst_34 {dimension_numbers = #tpu.dot_dimension_numbers<[1], [0], [0], [1], [0, 0, 1, 1], [], []>} : vector<8x147xbf16>, vector<147x256xbf16>, vector<8x256xf32> -> vector<8x256xf32>
    %28 = arith.maximumf %23, %27 : vector<8x256xf32>
    %c0_35 = arith.constant 0 : index
    %c0_36 = arith.constant 0 : index
    %29 = vector.load %arg1[%c0_35, %c0_36] : memref<8x147xbf16, #tpu.memory_space<vmem>>, vector<8x147xbf16>
    %c0_37 = arith.constant 0 : index
    %c6 = arith.constant 6 : index
    %c0_38 = arith.constant 0 : index
    %c0_39 = arith.constant 0 : index
    %30 = vector.load %arg3[%c0_37, %c6, %c0_38, %c0_39] : memref<1x9x147x256xbf16, #tpu.memory_space<vmem>>, vector<1x1x147x256xbf16>
    %31 = vector.shape_cast %30 : vector<1x1x147x256xbf16> to vector<147x256xbf16>
    %cst_40 = arith.constant dense<0.000000e+00> : vector<8x256xf32>
    %32 = tpu.matmul %29, %31, %cst_40 {dimension_numbers = #tpu.dot_dimension_numbers<[1], [0], [0], [1], [0, 0, 1, 1], [], []>} : vector<8x147xbf16>, vector<147x256xbf16>, vector<8x256xf32> -> vector<8x256xf32>
    %33 = arith.maximumf %28, %32 : vector<8x256xf32>
    %c0_41 = arith.constant 0 : index
    %c0_42 = arith.constant 0 : index
    %34 = vector.load %arg1[%c0_41, %c0_42] : memref<8x147xbf16, #tpu.memory_space<vmem>>, vector<8x147xbf16>
    %c0_43 = arith.constant 0 : index
    %c7 = arith.constant 7 : index
    %c0_44 = arith.constant 0 : index
    %c0_45 = arith.constant 0 : index
    %35 = vector.load %arg3[%c0_43, %c7, %c0_44, %c0_45] : memref<1x9x147x256xbf16, #tpu.memory_space<vmem>>, vector<1x1x147x256xbf16>
    %36 = vector.shape_cast %35 : vector<1x1x147x256xbf16> to vector<147x256xbf16>
    %cst_46 = arith.constant dense<0.000000e+00> : vector<8x256xf32>
    %37 = tpu.matmul %34, %36, %cst_46 {dimension_numbers = #tpu.dot_dimension_numbers<[1], [0], [0], [1], [0, 0, 1, 1], [], []>} : vector<8x147xbf16>, vector<147x256xbf16>, vector<8x256xf32> -> vector<8x256xf32>
    %38 = arith.maximumf %33, %37 : vector<8x256xf32>
    %c0_47 = arith.constant 0 : index
    %c0_48 = arith.constant 0 : index
    %39 = vector.load %arg1[%c0_47, %c0_48] : memref<8x147xbf16, #tpu.memory_space<vmem>>, vector<8x147xbf16>
    %c0_49 = arith.constant 0 : index
    %c8 = arith.constant 8 : index
    %c0_50 = arith.constant 0 : index
    %c0_51 = arith.constant 0 : index
    %40 = vector.load %arg3[%c0_49, %c8, %c0_50, %c0_51] : memref<1x9x147x256xbf16, #tpu.memory_space<vmem>>, vector<1x1x147x256xbf16>
    %41 = vector.shape_cast %40 : vector<1x1x147x256xbf16> to vector<147x256xbf16>
    %cst_52 = arith.constant dense<0.000000e+00> : vector<8x256xf32>
    %42 = tpu.matmul %39, %41, %cst_52 {dimension_numbers = #tpu.dot_dimension_numbers<[1], [0], [0], [1], [0, 0, 1, 1], [], []>} : vector<8x147xbf16>, vector<147x256xbf16>, vector<8x256xf32> -> vector<8x256xf32>
    %43 = arith.maximumf %38, %42 : vector<8x256xf32>
    %c0_53 = arith.constant 0 : index
    %c0_54 = arith.constant 0 : index
    %44 = vector.load %arg2[%c0_53, %c0_54] : memref<8x1xf32, #tpu.memory_space<vmem>>, vector<8x1xf32>
    %45 = vector.broadcast %44 : vector<8x1xf32> to vector<8x256xf32>
    %46 = arith.addf %43, %45 : vector<8x256xf32>
    %cst_55 = arith.constant 0.000000e+00 : f32
    %47 = vector.broadcast %cst_55 : f32 to vector<8x256xf32>
    %48 = arith.maximumf %46, %47 : vector<8x256xf32>
    %c0_56 = arith.constant 0 : index
    %c0_57 = arith.constant 0 : index
    %c0_58 = arith.constant 0 : index
    %49 = vector.load %arg4[%c0_56, %c0_57, %c0_58] : memref<1x8x256xf32, #tpu.memory_space<vmem>>, vector<1x8x256xf32>
    %50 = vector.shape_cast %49 : vector<1x8x256xf32> to vector<8x256xf32>
    %51 = vector.shape_cast %48 : vector<8x256xf32> to vector<1x8x256xf32>
    tpu.vector_store %arg4[%c0_56, %c0_57, %c0_58], %51 {strides = array<i32>} : memref<1x8x256xf32, #tpu.memory_space<vmem>>, vector<1x8x256xf32>,
    return
  }
  func.func @transform_0(%arg0: i32) -> (i32, i32) {
    %c0_i32 = arith.constant 0 : i32
    %c0_i32_0 = arith.constant 0 : i32
    %c0_i32_1 = arith.constant 0 : i32
    return %c0_i32, %c0_i32_0 : i32, i32
  }
  func.func @transform_1(%arg0: i32) -> (i32, i32) {
    %c0_i32 = arith.constant 0 : i32
    %c0_i32_0 = arith.constant 0 : i32
    %c0_i32_1 = arith.constant 0 : i32
    return %c0_i32, %c0_i32_0 : i32, i32
  }
  func.func @transform_2(%arg0: i32) -> (i32, i32, i32, i32) {
    %c0_i32 = arith.constant 0 : i32
    %c0_i32_0 = arith.constant 0 : i32
    %c0_i32_1 = arith.constant 0 : i32
    %c0_i32_2 = arith.constant 0 : i32
    return %arg0, %c0_i32, %c0_i32_0, %c0_i32_1 : i32, i32, i32, i32
  }
  func.func @transform_3(%arg0: i32) -> (i32, i32, i32) {
    %c0_i32 = arith.constant 0 : i32
    %c0_i32_0 = arith.constant 0 : i32
    %c0_i32_1 = arith.constant 0 : i32
    return %arg0, %c0_i32, %c0_i32_0 : i32, i32, i32
  }
}

</mosaic_0001>

<bundles_post_ra>
// kernel: tpu_custom_call.1
= control target key start
LH: loop header
LB: loop body
LE: loop exit
PB: predicated region body
PF: predicated region fallthrough
CT: control target
= control target key end

     0   :  { %8 = vsyncpa [#allocation3], 0  ;;  %s3501_s0 = inlined_call_operand.vmem [shape: bf16[8,147], index: 0, kind: input, shape index: {}]   ;;  %s3502_s1 = inlined_call_operand.vmem [shape: f32[8,1], index: 1, kind: input, shape index: {}]   ;;  %s3503_s2 = inlined_call_operand.vmem [shape: bf16[2,9,147,256], index: 2, kind: input, shape index: {}]   ;;  %s3504_s3 = inlined_call_operand.hbm [shape: f32[2,8,256], index: 3, kind: output, shape index: {}]  }
   0x1   :  { %10 = vsyncpa [#allocation3 + $0x1], 0  ;;  %s2966_s12 = smov 0   ;;  %s2968_s13 = smov 0  }
   0x2   :  { %s2970_s14 = smov 0   ;;  %s2972_s15 = smov 0  }
   0x3 LB: > { %s2987_s16 = sadd.s32 4294967295, %s2942_s15   ;;  %s1845_s17 = sadd.s32 4294967294, %s2942_s15   ;;  %s2942_s15 = sphi %s2972_s15, %s3510_s15   ;;  %s2938_s14 = sphi %s2970_s14, %s3509_s14   ;;  %s2934_s13 = sphi %s2968_s13, %s3508_s13   ;;  %s2930_s12 = sphi %s2966_s12, %s3507_s12  }
   0x4   : > { %s2991_s18 = sadd.s32 1, %s2942_s15   ;;  %s91_s19 = sadd.s32 1, %s2938_s14 }
   0x5   : > { %s88_s20 = ssub.s32 %s2942_s15, %s2991_s18  ;;  %p101_p0 = scmp.ne.s32.totalorder %s2938_s14, %s2934_s13 }
   0x6   : > { %p89_p1 = scmp.eq.s32.totalorder %s88_s20, 0  ;;  %p102_p2 = scmp.eq.s32.totalorder %s2987_s16, 1 }
   0x7   : > { %p107_p3 = scmp.ne.s32.totalorder %s2934_s13, %s2930_s12  ;;  %p108_p4 = scmp.eq.s32.totalorder %s1845_s17, 1 }
   0x8   : > { %s3002_s21 = scalar_select %p89_p1, %s2938_s14, %s91_s19  }
   0x9   : > { %p3004_p5 = por %p102_p2, %p101_p0  ;;  %p3008_p6 = por %p108_p4, %p107_p3 }
   0xa   : > { %p1848_p7 = scmp.ge.s32.totalorder %s2942_s15, 1  ;;  %p140_p8 = scmp.lt.s32.totalorder %s2942_s15, 3 }
   0xc   : > { %p141_p9 = pnand %p1848_p7, %p140_p8 }
   0xd   : > { %p164_p10 = scmp.lt.s32.totalorder (!%p141_p9), %s2987_s16, 1  ;;  %s161_s6 = sand.u32 (!%p141_p9), 1, %s2934_s13  }
   0xe   : > { %144 = sbr.rel (%p141_p9) target bundleno = 359 (0x167), region = 32  ;;  %s1849_s7 = sshll.u32 (!%p141_p9), %s161_s6, 4 }
   0xf   : > { %s2836_s8 = sshll.u32 (!%p141_p9), %s2987_s16, 4  ;;  %s163_s17 = scalar_lea.vmem (!%p141_p9), [#allocation2], %s1849_s7 }
  0x10   : > { %s1781_s11 = scalar_lea.hbm (!%p141_p9), %s3504_s3, %s2836_s8  ;;  %s1783_s19 = sshll.u32 (!%p141_p9), %s163_s17, 4  ;;  %s1784_s19 = int_to_ptr.vmem [resolvable:$true] %s1783_s19 }
  0x11   : > { %s1770_s20 = scalar_lea.sflag (!%p141_p9), [#allocation3], %s161_s6 }
  0x13   : > { %s165_s24 = scalar_select %p164_p10, %s2987_s16, 1  ;;  %vm295_vm0 = vcmask 1040384   ;;  %vm296_vm1 = vcmask 1041408   ;;  %v2944_v0 = vmov 65535   ;;  %v3036_v17 = vld [vmem:[%s3501_s0] sm:$0xff]  ;;  %vm291_vm2 = vcmask 154624  }
  0x14   : > { %v297_v1 = vsel %vm295_vm0, 4294967295, %v2944_v0  ;;  %v192_v37 = vunpack.c.h.b16 %v3036_v17  ;;  %s1785_s16 = sshll.u32 %s1781_s11, 4  ;;  %s1786_s16 = int_to_ptr.hbm [resolvable:$true] %s1785_s16 }
  0x15   : > { %s2837_s25 = smul.u32 1368, %s165_s24  ;;  %v3031_v15 = vsel %vm296_vm1, %v297_v1, 0  ;;  %s2894_s24 = sshra.s32 %s1786_s16, 4  ;;  %s2895_s24 = int_to_ptr.hbm [resolvable:$true] %s2894_s24 }
  0x16   : > { %v3065_v53 = vpack.c.b16 %v192_v37, %v192_v37  ;;  %p2901_p0 = scmp.lt.s32.totalorder %s2895_s24, %s3504_s3 }
  0x17   : > { %s3019_s28 = scalar_lea.vmem %s3503_s2, %s2837_s25  ;;  %s2896_s25 = scalar_lea.hbm %s2895_s24, 16 }
  0x18   : > { %v1909_v2 = vld [vmem:[%s3019_s28 + $0x70] sm:$0xf]  ;;  %v2689_v3 = vld [vmem:[%s3019_s28 + $0x74] sm:$0xf0]  ;;  %v2688_v4 = vld [vmem:[%s3019_s28 + $0x74] sm:$0xf]  ;;  %p2897_p11 = scmp.ne.s32.totalorder %s2895_s24, %s2896_s25 }
  0x19   : > { %v1910_v5 = vor.u32 %v2689_v3, %v1909_v2  ;;  %v1911_v6 = vld [vmem:[%s3019_s28 + $0x78] sm:$0xf0]  ;;  %v1901_v7 = vld [vmem:[%s3019_s28 + $0x60] sm:$0xf]  ;;  %v2687_v8 = vld [vmem:[%s3019_s28 + $0x64] sm:$0xf0] }
  0x1a   : > { %v1914_v9 = vor.u32 %v2688_v4, %v1911_v6  ;;  %v189_v10 = vld [vmem:[%s3019_s28 + $0x90] sm:$0x33]  ;;  %v2686_v11 = vld [vmem:[%s3019_s28 + $0x64] sm:$0xf]  ;;  %v1903_v12 = vld [vmem:[%s3019_s28 + $0x68] sm:$0xf0]  ;;  %v1902_v13 = vor.u32 %v2687_v8, %v1901_v7  ;;  %p2898_p12 = pnand %p2897_p11, %p3004_p5 }
  0x1b   : > { %305 = vmatpush.bf16.msra.mxu0 %v1910_v5  ;;  %v251_v14 = vunpack.c.l.b16 %v189_v10  ;;  %v252_v16 = vunpack.c.h.b16 %v189_v10  ;;  %v1906_v18 = vor.u32 %v2686_v11, %v1903_v12  ;;  %v1893_v19 = vld [vmem:[%s3019_s28 + $0x50] sm:$0xf]  ;;  %v2685_v20 = vld [vmem:[%s3019_s28 + $0x54] sm:$0xf0]  ;;  %v1917_v21 = vld [vmem:[%s3019_s28 + $0x80] sm:$0xf] }
  0x1c   : > { %331 = vmatpush.bf16.msra.mxu2 %v1914_v9  ;;  %v2691_v24 = vld [vmem:[%s3019_s28 + $0x84] sm:$0xf0]  ;;  %v2684_v25 = vld [vmem:[%s3019_s28 + $0x54] sm:$0xf]  ;;  %v1895_v26 = vld [vmem:[%s3019_s28 + $0x58] sm:$0xf0]  ;;  %v1894_v32 = vor.u32 %v2685_v20, %v1893_v19  ;;  %p2899_p13 = pneg %p2898_p12 }
  0x1d   : > { %v271_v22 = vpack.c.b16 %v251_v14, %v251_v14  ;;  %v272_v23 = vpack.c.b16 %v252_v16, %v252_v16  ;;  %v2690_v27 = vld [vmem:[%s3019_s28 + $0x84] sm:$0xf]  ;;  %v1919_v28 = vld [vmem:[%s3019_s28 + $0x88] sm:$0xf0]  ;;  %v2002_v33 = vld [vmem:[%s3019_s28 + $0x108] sm:$0xf]  ;;  %v1898_v36 = vor.u32 %v2684_v25, %v1895_v26  ;;  %v1918_v40 = vor.u32 %v2691_v24, %v1917_v21 }
  0x1e   : > { %v3047_v29 = vld [vmem:[%s3019_s28 + $0x128] sm:$0x33]  ;;  %v2707_v34 = vld [vmem:[%s3019_s28 + $0x10c] sm:$0xf0]  ;;  %v1885_v38 = vld [vmem:[%s3019_s28 + $0x40] sm:$0xf]  ;;  %v1922_v41 = vor.u32 %v2690_v27, %v1919_v28 }
  0x1f   : > { %306 = vmatpush.bf16.msra.mxu0 %v1902_v13  ;;  %v300_v30 = vand.u32 %v3031_v15, %v271_v22  ;;  %v303_v31 = vand.u32 %v3031_v15, %v272_v23  ;;  %v432_v35 = vunpack.c.l.b16 %v3047_v29  ;;  %v2683_v39 = vld [vmem:[%s3019_s28 + $0x44] sm:$0xf0]  ;;  %v2682_v43 = vld [vmem:[%s3019_s28 + $0x44] sm:$0xf]  ;;  %v1887_v44 = vld [vmem:[%s3019_s28 + $0x48] sm:$0xf0]  ;;  %v2003_v45 = vor.u32 %v2707_v34, %v2002_v33 }
  0x20   : > { %332 = vmatpush.bf16.msra.mxu2 %v1906_v18  ;;  %v1994_v46 = vld [vmem:[%s3019_s28 + $0xf8] sm:$0xf]  ;;  %v2705_v47 = vld [vmem:[%s3019_s28 + $0xfc] sm:$0xf0]  ;;  %v1886_v49 = vor.u32 %v2683_v39, %v1885_v38  ;;  %v2706_v52 = vld [vmem:[%s3019_s28 + $0x10c] sm:$0xf]  ;;  %v1890_v54 = vor.u32 %v2682_v43, %v1887_v44 }
  0x21   : > { %324 = vmatpush.bf16.msra.mxu1 %v300_v30  ;;  %350 = vmatpush.bf16.msra.mxu3 %v303_v31  ;;  %v452_v42 = vpack.c.b16 %v432_v35, %v432_v35  ;;  %v2010_v50 = vld [vmem:[%s3019_s28 + $0x118] sm:$0xf]  ;;  %v2709_v51 = vld [vmem:[%s3019_s28 + $0x11c] sm:$0xf0]  ;;  %v2004_v55 = vld [vmem:[%s3019_s28 + $0x110] sm:$0xf0]  ;;  %v1995_v60 = vor.u32 %v2705_v47, %v1994_v46 }
  0x22   : > { %v1877_v56 = vld [vmem:[%s3019_s28 + $0x30] sm:$0xf]  ;;  %v2681_v57 = vld [vmem:[%s3019_s28 + $0x34] sm:$0xf0]  ;;  %v2680_v58 = vld [vmem:[%s3019_s28 + $0x34] sm:$0xf]  ;;  %v2011_v61 = vor.u32 %v2709_v51, %v2010_v50  ;;  %v2007_v62 = vor.u32 %v2706_v52, %v2004_v55 }
  0x23   : > { %307 = vmatpush.bf16.msra.mxu0 %v1894_v32  ;;  %v473_v48 = vand.u32 %v452_v42, %v3031_v15  ;;  %v1879_v59 = vld [vmem:[%s3019_s28 + $0x38] sm:$0xf0]  ;;  %v1878_v63 = vor.u32 %v2681_v57, %v1877_v56  ;;  %v1986_v0 = vld [vmem:[%s3019_s28 + $0xe8] sm:$0xf]  ;;  %v2703_v1 = vld [vmem:[%s3019_s28 + $0xec] sm:$0xf0] }
  0x24   : > { %333 = vmatpush.bf16.msra.mxu2 %v1898_v36  ;;  %v2704_v2 = vld [vmem:[%s3019_s28 + $0xfc] sm:$0xf]  ;;  %v1882_v3 = vor.u32 %v2680_v58, %v1879_v59  ;;  %v1996_v4 = vld [vmem:[%s3019_s28 + $0x100] sm:$0xf0]  ;;  %v1869_v5 = vld [vmem:[%s3019_s28 + $0x20] sm:$0xf]  ;;  %v1987_v9 = vor.u32 %v2703_v1, %v1986_v0 }
  0x25   : > { %325 = vmatpush.bf16.msra.mxu1 %v1918_v40  ;;  %351 = vmatpush.bf16.msra.mxu3 %v1922_v41  ;;  %v2679_v6 = vld [vmem:[%s3019_s28 + $0x24] sm:$0xf0]  ;;  %v2678_v7 = vld [vmem:[%s3019_s28 + $0x24] sm:$0xf]  ;;  %v1871_v8 = vld [vmem:[%s3019_s28 + $0x28] sm:$0xf0]  ;;  %v1999_v10 = vor.u32 %v2704_v2, %v1996_v4  ;;  %v191_v41 = vunpack.c.l.b16 %v3036_v17 }
  0x26   : > { %v1870_v11 = vor.u32 %v2679_v6, %v1869_v5  ;;  %v1978_v12 = vld [vmem:[%s3019_s28 + $0xd8] sm:$0xf]  ;;  %v2701_v13 = vld [vmem:[%s3019_s28 + $0xdc] sm:$0xf0]  ;;  %v2702_v14 = vld [vmem:[%s3019_s28 + $0xec] sm:$0xf]  ;;  %v1874_v16 = vor.u32 %v2678_v7, %v1871_v8 }
  0x27   : > { %308 = vmatpush.bf16.msra.mxu0 %v1886_v49  ;;  %v1988_v18 = vld [vmem:[%s3019_s28 + $0xf0] sm:$0xf0]  ;;  %v1861_v19 = vld [vmem:[%s3019_s28 + $0x10] sm:$0xf]  ;;  %v2677_v20 = vld [vmem:[%s3019_s28 + $0x14] sm:$0xf0]  ;;  %v1979_v23 = vor.u32 %v2701_v13, %v1978_v12 }
  0x28   : > { %1924 = vmatmul.msk.bf16.vlgmr.msra.gmra.mxu3 %vm291_vm2, %v3065_v53  ;;  %334 = vmatpush.bf16.msra.mxu2 %v1890_v54  ;;  %v2676_v21 = vld [vmem:[%s3019_s28 + $0x14] sm:$0xf]  ;;  %v1863_v22 = vld [vmem:[%s3019_s28 + $0x18] sm:$0xf0]  ;;  %v1991_v24 = vor.u32 %v2702_v14, %v1988_v18  ;;  %v1862_v25 = vor.u32 %v2677_v20, %v1861_v19  ;;  %v1970_v26 = vld [vmem:[%s3019_s28 + $0xc8] sm:$0xf]  ;;  %v3111_v54 = vpack.c.b16 %v191_v41, %v191_v41 }
  0x29   : > { %478 = vmatpush.bf16.msrb.mxu1 %v2003_v45  ;;  %497 = vmatpush.bf16.msrb.mxu3 %v473_v48  ;;  %v2699_v27 = vld [vmem:[%s3019_s28 + $0xcc] sm:$0xf0]  ;;  %v2700_v28 = vld [vmem:[%s3019_s28 + $0xdc] sm:$0xf]  ;;  %v1866_v30 = vor.u32 %v2676_v21, %v1863_v22  ;;  %v1980_v31 = vld [vmem:[%s3019_s28 + $0xe0] sm:$0xf0] }
  0x2a   : > { %1923 = vmatmul.msk.bf16.vlgmr.msra.gmra.mxu1 %vm291_vm2, %v3065_v53  ;;  %v1853_v32 = vld [vmem:[%s3019_s28] sm:$0xf]  ;;  %v2675_v33 = vld [vmem:[%s3019_s28 + $0x4] sm:$0xf0]  ;;  %v2674_v34 = vld [vmem:[%s3019_s28 + $0x4] sm:$0xf]  ;;  %v1971_v37 = vor.u32 %v2699_v27, %v1970_v26  ;;  %v1983_v42 = vor.u32 %v2700_v28, %v1980_v31 }
  0x2b   : > { %309 = vmatpush.bf16.msra.mxu0 %v1878_v63  ;;  %v1855_v35 = vld [vmem:[%s3019_s28 + $0x8] sm:$0xf0]  ;;  %v2095_v36 = vld [vmem:[%s3019_s28 + $0x1a0] sm:$0xf]  ;;  %v2725_v38 = vld [vmem:[%s3019_s28 + $0x1a4] sm:$0xf0]  ;;  %v1854_v43 = vor.u32 %v2675_v33, %v1853_v32 }
  0x2c   : > { %335 = vmatpush.bf16.msra.mxu2 %v1882_v3  ;;  %v2724_v39 = vld [vmem:[%s3019_s28 + $0x1a4] sm:$0xf]  ;;  %v2097_v40 = vld [vmem:[%s3019_s28 + $0x1a8] sm:$0xf0]  ;;  %v1962_v44 = vld [vmem:[%s3019_s28 + $0xb8] sm:$0xf]  ;;  %v1858_v46 = vor.u32 %v2674_v34, %v1855_v35  ;;  %v2096_v49 = vor.u32 %v2725_v38, %v2095_v36 }
  0x2d   : > { %479 = vmatpush.bf16.msrb.mxu1 %v1995_v60  ;;  %498 = vmatpush.bf16.msrb.mxu3 %v2011_v61  ;;  %v2697_v45 = vld [vmem:[%s3019_s28 + $0xbc] sm:$0xf0]  ;;  %v2698_v47 = vld [vmem:[%s3019_s28 + $0xcc] sm:$0xf]  ;;  %v1972_v48 = vld [vmem:[%s3019_s28 + $0xd0] sm:$0xf0]  ;;  %v2100_v50 = vor.u32 %v2724_v39, %v2097_v40 }
  0x2e   : > { %v2087_v51 = vld [vmem:[%s3019_s28 + $0x190] sm:$0xf]  ;;  %v2036_v17 = vld [vmem:[%s3019_s28 + $0x1c0] sm:$0x33]  ;;  %v1963_v52 = vor.u32 %v2697_v45, %v1962_v44  ;;  %v2723_v55 = vld [vmem:[%s3019_s28 + $0x194] sm:$0xf0]  ;;  %v1975_v58 = vor.u32 %v2698_v47, %v1972_v48 }
  0x2f   : > { %310 = vmatpush.bf16.msra.mxu0 %v1870_v11  ;;  %v2722_v56 = vld [vmem:[%s3019_s28 + $0x194] sm:$0xf]  ;;  %v2089_v57 = vld [vmem:[%s3019_s28 + $0x198] sm:$0xf0]  ;;  %v1954_v59 = vld [vmem:[%s3019_s28 + $0xa8] sm:$0xf]  ;;  %v607_v61 = vunpack.c.l.b16 %v2036_v17  ;;  %v2088_v0 = vor.u32 %v2723_v55, %v2087_v51  ;;  %v433_v11 = vunpack.c.h.b16 %v3047_v29  ;;  %v608_v14 = vunpack.c.h.b16 %v2036_v17 }
  0x30   : > { %336 = vmatpush.bf16.msra.mxu2 %v1874_v16  ;;  %v2695_v60 = vld [vmem:[%s3019_s28 + $0xac] sm:$0xf0]  ;;  %v1964_v63 = vld [vmem:[%s3019_s28 + $0xc0] sm:$0xf0]  ;;  %v2092_v1 = vor.u32 %v2722_v56, %v2089_v57  ;;  %v2079_v2 = vld [vmem:[%s3019_s28 + $0x180] sm:$0xf] }
  0x31   : > { %504 = vmatpush.bf16.msra.mxu3 %v2007_v62  ;;  %480 = vmatpush.bf16.msrb.mxu1 %v1987_v9  ;;  %v2696_v62 = vld [vmem:[%s3019_s28 + $0xbc] sm:$0xf]  ;;  %v1955_v3 = vor.u32 %v2695_v60, %v1954_v59  ;;  %v2721_v4 = vld [vmem:[%s3019_s28 + $0x184] sm:$0xf0]  ;;  %v2720_v5 = vld [vmem:[%s3019_s28 + $0x184] sm:$0xf]  ;;  %v453_v26 = vpack.c.b16 %v433_v11, %v433_v11  ;;  %v628_v31 = vpack.c.b16 %v608_v14, %v608_v14 }
  0x32   : > { %v2081_v6 = vld [vmem:[%s3019_s28 + $0x188] sm:$0xf0]  ;;  %v1967_v7 = vor.u32 %v2696_v62, %v1964_v63  ;;  %v1946_v8 = vld [vmem:[%s3019_s28 + $0x98] sm:$0xf]  ;;  %v2693_v9 = vld [vmem:[%s3019_s28 + $0x9c] sm:$0xf0]  ;;  %v2080_v16 = vor.u32 %v2721_v4, %v2079_v2 }
  0x33   : > { %311 = vmatpush.bf16.msra.mxu0 %v1862_v25  ;;  %v2694_v12 = vld [vmem:[%s3019_s28 + $0xac] sm:$0xf]  ;;  %v1956_v13 = vld [vmem:[%s3019_s28 + $0xb0] sm:$0xf0]  ;;  %v2084_v18 = vor.u32 %v2720_v5, %v2081_v6  ;;  %v1947_v19 = vor.u32 %v2693_v9, %v1946_v8  ;;  %v2071_v20 = vld [vmem:[%s3019_s28 + $0x170] sm:$0xf]  ;;  %v476_v40 = vand.u32 %v453_v26, %v3031_v15 }
  0x34   : > { %337 = vmatpush.bf16.msra.mxu2 %v1866_v30  ;;  %v2719_v21 = vld [vmem:[%s3019_s28 + $0x174] sm:$0xf0]  ;;  %v1959_v22 = vor.u32 %v2694_v12, %v1956_v13  ;;  %v2692_v29 = vld [vmem:[%s3019_s28 + $0x9c] sm:$0xf]  ;;  %v1948_v27 = vld [vmem:[%s3019_s28 + $0xa0] sm:$0xf0] }
  0x35   : > { %505 = vmatpush.bf16.msra.mxu3 %v1999_v10  ;;  %481 = vmatpush.bf16.msrb.mxu1 %v1979_v23  ;;  %v627_v10 = vpack.c.b16 %v607_v61, %v607_v61  ;;  %v2718_v23 = vld [vmem:[%s3019_s28 + $0x174] sm:$0xf]  ;;  %v2103_v28 = vld [vmem:[%s3019_s28 + $0x1b0] sm:$0xf]  ;;  %v2727_v30 = vld [vmem:[%s3019_s28 + $0x1b4] sm:$0xf0]  ;;  %v2072_v32 = vor.u32 %v2719_v21, %v2071_v20  ;;  %v1951_v36 = vor.u32 %v2692_v29, %v1948_v27 }
  0x36   : > { %v2063_v34 = vld [vmem:[%s3019_s28 + $0x160] sm:$0xf]  ;;  %v2717_v35 = vld [vmem:[%s3019_s28 + $0x164] sm:$0xf0]  ;;  %v2065_v38 = vld [vmem:[%s3019_s28 + $0x168] sm:$0xf0]  ;;  %v2104_v39 = vor.u32 %v2727_v30, %v2103_v28 }
  0x37   : > { %312 = vmatpush.bf16.msra.mxu0 %v1854_v43  ;;  %v648_v25 = vand.u32 %v627_v10, %v3031_v15  ;;  %v2708_v41 = vld [vmem:[%s3019_s28 + $0x11c] sm:$0xf]  ;;  %v651_v43 = vand.u32 %v628_v31, %v3031_v15  ;;  %v2064_v44 = vor.u32 %v2717_v35, %v2063_v34  ;;  %v2188_v45 = vld [vmem:[%s3019_s28 + $0x238] sm:$0xf]  ;;  %v2714_v17 = vld [vmem:[%s3019_s28 + $0x154] sm:$0xf] }
  0x38   : > { %2016 = vmatmul.msk.bf16.vlgmr.msrb.gmra.mxu3 %vm291_vm2, %v3065_v53  ;;  %338 = vmatpush.bf16.msra.mxu2 %v1858_v46  ;;  %v2726_v46 = vld [vmem:[%s3019_s28 + $0x1b4] sm:$0xf]  ;;  %v2105_v47 = vld [vmem:[%s3019_s28 + $0x1b8] sm:$0xf0]  ;;  %v2715_v51 = vld [vmem:[%s3019_s28 + $0x154] sm:$0xf0] }
  0x39   : > { %506 = vmatpush.bf16.msra.mxu3 %v1991_v24  ;;  %482 = vmatpush.bf16.msrb.mxu1 %v1971_v37  ;;  %v2073_v24 = vld [vmem:[%s3019_s28 + $0x178] sm:$0xf0]  ;;  %v2716_v37 = vld [vmem:[%s3019_s28 + $0x164] sm:$0xf]  ;;  %v2108_v56 = vor.u32 %v2726_v46, %v2105_v47  ;;  %v2180_v60 = vld [vmem:[%s3019_s28 + $0x228] sm:$0xf] }
  0x3a   : > { %313 = vmatmul.bf16.vlgmr.msra.gmra.mxu0 %v3111_v54  ;;  %v2076_v33 = vor.u32 %v2718_v23, %v2073_v24  ;;  %v2068_v48 = vor.u32 %v2716_v37, %v2065_v38  ;;  %v2129_v57 = vld [vmem:[%s3019_s28 + $0x258] sm:$0x33]  ;;  %v2741_v62 = vld [vmem:[%s3019_s28 + $0x22c] sm:$0xf0]  ;;  %v2047_v63 = vld [vmem:[%s3019_s28 + $0x140] sm:$0xf] }
  0x3b   : > { %679 = vmatpush.bf16.msrb.mxu0 %v2100_v50  ;;  %339 = vmatmul.bf16.vlgmr.msra.gmra.mxu2 %v3111_v54  ;;  %v2055_v50 = vld [vmem:[%s3019_s28 + $0x150] sm:$0xf]  ;;  %v2049_v2 = vld [vmem:[%s3019_s28 + $0x148] sm:$0xf0]  ;;  %v783_v4 = vunpack.c.h.b16 %v2129_v57  ;;  %v2181_v5 = vor.u32 %v2741_v62, %v2180_v60  ;;  %v2172_v8 = vld [vmem:[%s3019_s28 + $0x218] sm:$0xf] }
  0x3c   : > { %653 = vmatpush.bf16.msrb.mxu2 %v2096_v49  ;;  %v2743_v49 = vld [vmem:[%s3019_s28 + $0x23c] sm:$0xf0]  ;;  %v2056_v59 = vor.u32 %v2715_v51, %v2055_v50  ;;  %v2742_v10 = vld [vmem:[%s3019_s28 + $0x23c] sm:$0xf]  ;;  %v2190_v11 = vld [vmem:[%s3019_s28 + $0x240] sm:$0xf0] }
  0x3d   : > { %507 = vmatpush.bf16.msra.mxu3 %v1983_v42  ;;  %483 = vmatpush.bf16.msrb.mxu1 %v1963_v52  ;;  %v2012_v42 = vld [vmem:[%s3019_s28 + $0x120] sm:$0xf0]  ;;  %v2057_v52 = vld [vmem:[%s3019_s28 + $0x158] sm:$0xf0]  ;;  %v2739_v9 = vld [vmem:[%s3019_s28 + $0x21c] sm:$0xf0]  ;;  %v2193_v21 = vor.u32 %v2742_v10, %v2190_v11 }
  0x3e   : > { %v2015_v55 = vor.u32 %v2708_v41, %v2012_v42  ;;  %v2060_v61 = vor.u32 %v2714_v17, %v2057_v52  ;;  %v2039_v12 = vld [vmem:[%s3019_s28 + $0x130] sm:$0xf]  ;;  %v2711_v13 = vld [vmem:[%s3019_s28 + $0x134] sm:$0xf0]  ;;  %v2173_v20 = vor.u32 %v2739_v9, %v2172_v8  ;;  %v2164_v29 = vld [vmem:[%s3019_s28 + $0x208] sm:$0xf] }
  0x3f   : > { %680 = vmatpush.bf16.msrb.mxu0 %v2092_v1  ;;  %v2712_v1 = vld [vmem:[%s3019_s28 + $0x144] sm:$0xf]  ;;  %v2737_v23 = vld [vmem:[%s3019_s28 + $0x20c] sm:$0xf0]  ;;  %v2740_v26 = vld [vmem:[%s3019_s28 + $0x22c] sm:$0xf] }
  0x40   : > { %654 = vmatpush.bf16.msrb.mxu2 %v2088_v0  ;;  %v2713_v0 = vld [vmem:[%s3019_s28 + $0x144] sm:$0xf0]  ;;  %v2182_v27 = vld [vmem:[%s3019_s28 + $0x230] sm:$0xf0]  ;;  %v2745_v31 = vld [vmem:[%s3019_s28 + $0x24c] sm:$0xf0]  ;;  %v2165_v34 = vor.u32 %v2737_v23, %v2164_v29 }
  0x41   : > { %508 = vmatpush.bf16.msra.mxu3 %v1975_v58  ;;  %484 = vmatpush.bf16.msrb.mxu1 %v1955_v3  ;;  %v2189_v58 = vor.u32 %v2743_v49, %v2188_v45  ;;  %v782_v3 = vunpack.c.l.b16 %v2129_v57  ;;  %v2048_v6 = vor.u32 %v2713_v0, %v2047_v63  ;;  %v2196_v28 = vld [vmem:[%s3019_s28 + $0x248] sm:$0xf]  ;;  %v2281_v35 = vld [vmem:[%s3019_s28 + $0x2d0] sm:$0xf]  ;;  %v2156_v37 = vld [vmem:[%s3019_s28 + $0x1f8] sm:$0xf]  ;;  %v2185_v38 = vor.u32 %v2740_v26, %v2182_v27 }
  0x42   : > { %v2283_v41 = vld [vmem:[%s3019_s28 + $0x2d8] sm:$0xf0]  ;;  %v2197_v42 = vor.u32 %v2745_v31, %v2196_v28  ;;  %v2273_v49 = vld [vmem:[%s3019_s28 + $0x2c0] sm:$0xf]  ;;  %v2759_v50 = vld [vmem:[%s3019_s28 + $0x2c4] sm:$0xf0] }
  0x43   : > { %681 = vmatpush.bf16.msrb.mxu0 %v2084_v18  ;;  %v802_v14 = vpack.c.b16 %v782_v3, %v782_v3  ;;  %v2041_v18 = vld [vmem:[%s3019_s28 + $0x138] sm:$0xf0]  ;;  %v2148_v51 = vld [vmem:[%s3019_s28 + $0x1e8] sm:$0xf]  ;;  %v2733_v52 = vld [vmem:[%s3019_s28 + $0x1ec] sm:$0xf0] }
  0x44   : > { %655 = vmatpush.bf16.msrb.mxu2 %v2080_v16  ;;  %v2710_v16 = vld [vmem:[%s3019_s28 + $0x134] sm:$0xf]  ;;  %v2736_v57 = vld [vmem:[%s3019_s28 + $0x20c] sm:$0xf]  ;;  %v2265_v63 = vld [vmem:[%s3019_s28 + $0x2b0] sm:$0xf] }
  0x45   : > { %509 = vmatpush.bf16.msra.mxu3 %v1967_v7  ;;  %485 = vmatpush.bf16.msrb.mxu1 %v1947_v19  ;;  %v2052_v7 = vor.u32 %v2712_v1, %v2049_v2  ;;  %v803_v19 = vpack.c.b16 %v783_v4, %v783_v4  ;;  %v2044_v24 = vor.u32 %v2710_v16, %v2041_v18  ;;  %v3208_v60 = vld [vmem:[%s3019_s28 + $0x2f0] sm:$0x33]  ;;  %v2757_v0 = vld [vmem:[%s3019_s28 + $0x2b4] sm:$0xf0]  ;;  %v2731_v3 = vld [vmem:[%s3019_s28 + $0x1dc] sm:$0xf0] }
  0x46   : > { %v2140_v2 = vld [vmem:[%s3019_s28 + $0x1d8] sm:$0xf]  ;;  %v2734_v4 = vld [vmem:[%s3019_s28 + $0x1fc] sm:$0xf]  ;;  %v957_v8 = vunpack.c.l.b16 %v3208_v60  ;;  %v2266_v9 = vor.u32 %v2757_v0, %v2265_v63  ;;  %v2257_v11 = vld [vmem:[%s3019_s28 + $0x2a0] sm:$0xf] }
  0x47   : > { %682 = vmatpush.bf16.msrb.mxu0 %v2076_v33  ;;  %v826_v30 = vand.u32 %v803_v19, %v3031_v15  ;;  %v2198_v33 = vld [vmem:[%s3019_s28 + $0x250] sm:$0xf0]  ;;  %v2141_v10 = vor.u32 %v2731_v3, %v2140_v2  ;;  %v2132_v16 = vld [vmem:[%s3019_s28 + $0x1c8] sm:$0xf]  ;;  %v2729_v18 = vld [vmem:[%s3019_s28 + $0x1cc] sm:$0xf0] }
  0x48   : > { %486 = vmatmul.bf16.vlgmr.msrb.gmra.mxu1 %v3111_v54  ;;  %656 = vmatpush.bf16.msrb.mxu2 %v2072_v32  ;;  %v2744_v32 = vld [vmem:[%s3019_s28 + $0x24c] sm:$0xf]  ;;  %v977_v29 = vpack.c.b16 %v957_v8, %v957_v8  ;;  %v2753_v26 = vld [vmem:[%s3019_s28 + $0x294] sm:$0xf0]  ;;  %v2748_v63 = vld [vmem:[%s3019_s28 + $0x274] sm:$0xf] }
  0x49   : > { %510 = vmatpush.bf16.msra.mxu3 %v1959_v22  ;;  %672 = vmatpush.bf16.msra.mxu1 %v648_v25  ;;  %v2040_v22 = vor.u32 %v2711_v13, %v2039_v12  ;;  %v823_v25 = vand.u32 %v802_v14, %v3031_v15  ;;  %v2201_v45 = vor.u32 %v2744_v32, %v2198_v33  ;;  %v2755_v12 = vld [vmem:[%s3019_s28 + $0x2a4] sm:$0xf0]  ;;  %v2732_v19 = vld [vmem:[%s3019_s28 + $0x1ec] sm:$0xf]  ;;  %v2142_v32 = vld [vmem:[%s3019_s28 + $0x1e0] sm:$0xf0] }
  0x4a   : > { %v2258_v23 = vor.u32 %v2755_v12, %v2257_v11  ;;  %v998_v31 = vand.u32 %v977_v29, %v3031_v15  ;;  %v2752_v33 = vld [vmem:[%s3019_s28 + $0x294] sm:$0xf]  ;;  %v2235_v0 = vld [vmem:[%s3019_s28 + $0x278] sm:$0xf0]  ;;  %v2778_v8 = vld [vmem:[%s3019_s28 + $0x36c] sm:$0xf] }
  0x4b   : > { %683 = vmatpush.bf16.msrb.mxu0 %v2068_v48  ;;  %v2225_v11 = vld [vmem:[%s3019_s28 + $0x260] sm:$0xf]  ;;  %v2747_v12 = vld [vmem:[%s3019_s28 + $0x264] sm:$0xf0]  ;;  %v2350_v29 = vld [vmem:[%s3019_s28 + $0x338] sm:$0xf] }
  0x4c   : > { %657 = vmatpush.bf16.msrb.mxu2 %v2064_v44  ;;  %v2174_v44 = vld [vmem:[%s3019_s28 + $0x220] sm:$0xf0] }
  0x4d   : > { %511 = vmatpush.bf16.msra.mxu3 %v1951_v36  ;;  %673 = vmatpush.bf16.msra.mxu1 %v2104_v39  ;;  %v2761_v36 = vld [vmem:[%s3019_s28 + $0x2d4] sm:$0xf0]  ;;  %v2735_v39 = vld [vmem:[%s3019_s28 + $0x1fc] sm:$0xf0] }
  0x4e   : > { %v2282_v46 = vor.u32 %v2761_v36, %v2281_v35  ;;  %v2157_v47 = vor.u32 %v2735_v39, %v2156_v37  ;;  %v958_v35 = vunpack.c.h.b16 %v3208_v60  ;;  %v2289_v37 = vld [vmem:[%s3019_s28 + $0x2e0] sm:$0xf]  ;;  %v2374_v39 = vld [vmem:[%s3019_s28 + $0x368] sm:$0xf] }
  0x4f   : > { %684 = vmatpush.bf16.msrb.mxu0 %v2060_v61  ;;  %v2149_v61 = vor.u32 %v2733_v52, %v2148_v51  ;;  %v2315_v51 = vld [vmem:[%s3019_s28 + $0x388] sm:$0x33] }
  0x50   : > { %512 = vmatmul.bf16.vlgmr.msra.gmra.mxu3 %v3111_v54  ;;  %658 = vmatpush.bf16.msrb.mxu2 %v2056_v59  ;;  %v2274_v59 = vor.u32 %v2759_v50, %v2273_v49  ;;  %v2243_v49 = vld [vmem:[%s3019_s28 + $0x288] sm:$0xf0]  ;;  %v978_v50 = vpack.c.b16 %v958_v35, %v958_v35  ;;  %v2467_v35 = vld [vmem:[%s3019_s28 + $0x400] sm:$0xf] }
  0x51   : > { %523 = vmatpush.bf16.msrb.mxu3 %v476_v40  ;;  %698 = vmatpush.bf16.msrb.mxu1 %v651_v43  ;;  %v2760_v40 = vld [vmem:[%s3019_s28 + $0x2d4] sm:$0xf]  ;;  %v2738_v43 = vld [vmem:[%s3019_s28 + $0x21c] sm:$0xf] }
  0x52   : > { %v2286_v48 = vor.u32 %v2760_v40, %v2283_v41  ;;  %v2177_v17 = vor.u32 %v2738_v43, %v2174_v44  ;;  %v2779_v40 = vld [vmem:[%s3019_s28 + $0x36c] sm:$0xf0]  ;;  %v2241_v41 = vld [vmem:[%s3019_s28 + $0x280] sm:$0xf] }
  0x53   : > { %685 = vmatpush.bf16.msrb.mxu0 %v2052_v7  ;;  %v2267_v7 = vld [vmem:[%s3019_s28 + $0x2b8] sm:$0xf0] }
  0x54   : > { %659 = vmatpush.bf16.msrb.mxu2 %v2048_v6  ;;  %v2756_v6 = vld [vmem:[%s3019_s28 + $0x2b4] sm:$0xf] }
  0x55   : > { %524 = vmatpush.bf16.msrb.mxu3 %v2015_v55  ;;  %699 = vmatpush.bf16.msrb.mxu1 %v2108_v56  ;;  %v2758_v55 = vld [vmem:[%s3019_s28 + $0x2c4] sm:$0xf]  ;;  %v2275_v56 = vld [vmem:[%s3019_s28 + $0x2c8] sm:$0xf0]  ;;  %v2270_v14 = vor.u32 %v2756_v6, %v2267_v7  ;;  %v2358_v6 = vld [vmem:[%s3019_s28 + $0x348] sm:$0xf] }
  0x56   : > { %v2278_v62 = vor.u32 %v2758_v55, %v2275_v56  ;;  %v2366_v55 = vld [vmem:[%s3019_s28 + $0x358] sm:$0xf]  ;;  %v2777_v56 = vld [vmem:[%s3019_s28 + $0x35c] sm:$0xf0]  ;;  %v2775_v7 = vld [vmem:[%s3019_s28 + $0x34c] sm:$0xf0] }
  0x57   : > { %686 = vmatpush.bf16.msrb.mxu0 %v2044_v24  ;;  %v2133_v24 = vor.u32 %v2729_v18, %v2132_v16  ;;  %v2367_v2 = vor.u32 %v2777_v56, %v2366_v55  ;;  %v2746_v16 = vld [vmem:[%s3019_s28 + $0x264] sm:$0xf]  ;;  %v2227_v18 = vld [vmem:[%s3019_s28 + $0x268] sm:$0xf0]  ;;  %v2794_v55 = vld [vmem:[%s3019_s28 + $0x3f4] sm:$0xf] }
  0x58   : > { %2109 = vmatmul.msk.bf16.vlgmr.msra.gmra.mxu1 %vm291_vm2, %v3065_v53  ;;  %660 = vmatpush.bf16.msrb.mxu2 %v2040_v22  ;;  %v2259_v22 = vld [vmem:[%s3019_s28 + $0x2a8] sm:$0xf0]  ;;  %v2461_v56 = vld [vmem:[%s3019_s28 + $0x3f8] sm:$0xf0] }
  0x59   : > { %828 = vmatpush.bf16.msra.mxu3 %v2189_v58  ;;  %854 = vmatpush.bf16.msra.mxu1 %v2193_v21  ;;  %v2166_v58 = vld [vmem:[%s3019_s28 + $0x210] sm:$0xf0]  ;;  %v2754_v21 = vld [vmem:[%s3019_s28 + $0x2a4] sm:$0xf] }
  0x5a   : > { %687 = vmatmul.bf16.vlgmr.msrb.gmra.mxu0 %v3111_v54  ;;  %v2169_v1 = vor.u32 %v2736_v57, %v2166_v58  ;;  %v2262_v28 = vor.u32 %v2754_v21, %v2259_v22  ;;  %v2233_v57 = vld [vmem:[%s3019_s28 + $0x270] sm:$0xf]  ;;  %v2749_v58 = vld [vmem:[%s3019_s28 + $0x274] sm:$0xf0]  ;;  %v2226_v22 = vor.u32 %v2747_v12, %v2225_v11 }
  0x5b   : > { %873 = vmatpush.bf16.msra.mxu0 %v826_v30  ;;  %661 = vmatmul.bf16.vlgmr.msrb.gmra.mxu2 %v3111_v54  ;;  %v2730_v30 = vld [vmem:[%s3019_s28 + $0x1dc] sm:$0xf]  ;;  %v2234_v3 = vor.u32 %v2749_v58, %v2233_v57  ;;  %v2352_v58 = vld [vmem:[%s3019_s28 + $0x340] sm:$0xf0]  ;;  %v2443_v12 = vld [vmem:[%s3019_s28 + $0x3d0] sm:$0xf] }
  0x5c   : > { %847 = vmatpush.bf16.msra.mxu2 %v823_v25  ;;  %v2249_v25 = vld [vmem:[%s3019_s28 + $0x290] sm:$0xf]  ;;  %v2145_v43 = vor.u32 %v2730_v30, %v2142_v32  ;;  %v2780_v32 = vld [vmem:[%s3019_s28 + $0x37c] sm:$0xf] }
  0x5d   : > { %829 = vmatpush.bf16.msra.mxu3 %v2181_v5  ;;  %855 = vmatpush.bf16.msra.mxu1 %v2185_v38  ;;  %v2158_v5 = vld [vmem:[%s3019_s28 + $0x200] sm:$0xf0]  ;;  %v2250_v36 = vor.u32 %v2753_v26, %v2249_v25  ;;  %v2763_v38 = vld [vmem:[%s3019_s28 + $0x2e4] sm:$0xf0]  ;;  %v2776_v26 = vld [vmem:[%s3019_s28 + $0x35c] sm:$0xf] }
  0x5e   : > { %v2161_v13 = vor.u32 %v2734_v4, %v2158_v5  ;;  %v2762_v4 = vld [vmem:[%s3019_s28 + $0x2e4] sm:$0xf]  ;;  %v2291_v5 = vld [vmem:[%s3019_s28 + $0x2e8] sm:$0xf0]  ;;  %v2772_v57 = vld [vmem:[%s3019_s28 + $0x33c] sm:$0xf] }
  0x5f   : > { %874 = vmatpush.bf16.msra.mxu0 %v2201_v45  ;;  %v2728_v45 = vld [vmem:[%s3019_s28 + $0x1cc] sm:$0xf] }
  0x60   : > { %2017 = vmatmul.msk.bf16.vlgmr.msrb.gmra.mxu3 %vm291_vm2, %v3065_v53  ;;  %848 = vmatpush.bf16.msra.mxu2 %v2197_v42  ;;  %v2751_v42 = vld [vmem:[%s3019_s28 + $0x284] sm:$0xf0] }
  0x61   : > { %830 = vmatpush.bf16.msra.mxu3 %v2173_v20  ;;  %856 = vmatpush.bf16.msra.mxu1 %v2177_v17  ;;  %v2150_v20 = vld [vmem:[%s3019_s28 + $0x1f0] sm:$0xf0]  ;;  %v2375_v17 = vor.u32 %v2779_v40, %v2374_v39  ;;  %v2242_v52 = vor.u32 %v2751_v42, %v2241_v41  ;;  %v2771_v39 = vld [vmem:[%s3019_s28 + $0x32c] sm:$0xf0]  ;;  %v2796_v40 = vld [vmem:[%s3019_s28 + $0x404] sm:$0xf] }
  0x62   : > { %v2153_v27 = vor.u32 %v2732_v19, %v2150_v20  ;;  %v2359_v20 = vor.u32 %v2775_v7, %v2358_v6  ;;  %v2469_v41 = vld [vmem:[%s3019_s28 + $0x408] sm:$0xf0]  ;;  %v2344_v7 = vld [vmem:[%s3019_s28 + $0x330] sm:$0xf0] }
  0x63   : > { %1029 = vmatpush.bf16.msrb.mxu0 %v2286_v48  ;;  %v2750_v48 = vld [vmem:[%s3019_s28 + $0x284] sm:$0xf]  ;;  %v2770_v6 = vld [vmem:[%s3019_s28 + $0x32c] sm:$0xf] }
  0x64   : > { %1003 = vmatpush.bf16.msrb.mxu2 %v2282_v46  ;;  %v2134_v46 = vld [vmem:[%s3019_s28 + $0x1d0] sm:$0xf0]  ;;  %v2246_v60 = vor.u32 %v2750_v48, %v2243_v49  ;;  %v2472_v48 = vor.u32 %v2796_v40, %v2469_v41  ;;  %v2459_v49 = vld [vmem:[%s3019_s28 + $0x3f0] sm:$0xf]  ;;  %v2815_v40 = vld [vmem:[%s3019_s28 + $0x49c] sm:$0xf0] }
  0x65   : > { %831 = vmatpush.bf16.msra.mxu3 %v2165_v34  ;;  %857 = vmatpush.bf16.msra.mxu1 %v2169_v1  ;;  %v2251_v34 = vld [vmem:[%s3019_s28 + $0x298] sm:$0xf0]  ;;  %v1133_v1 = vunpack.c.h.b16 %v2315_v51  ;;  %v2427_v41 = vld [vmem:[%s3019_s28 + $0x3b0] sm:$0xf] }
  0x66   : > { %v2254_v44 = vor.u32 %v2752_v33, %v2251_v34  ;;  %v2384_v33 = vld [vmem:[%s3019_s28 + $0x380] sm:$0xf0] }
  0x67   : > { %1030 = vmatpush.bf16.msrb.mxu0 %v2278_v62  ;;  %v1001_v62 = vand.u32 %v978_v50, %v3031_v15  ;;  %v1153_v19 = vpack.c.b16 %v1133_v1, %v1133_v1  ;;  %v2795_v50 = vld [vmem:[%s3019_s28 + $0x3f4] sm:$0xf0]  ;;  %v2326_v1 = vld [vmem:[%s3019_s28 + $0x308] sm:$0xf] }
  0x68   : > { %1004 = vmatpush.bf16.msrb.mxu2 %v2274_v59  ;;  %2110 = vmatmul.msk.bf16.vlgmr.msrb.gmra.mxu1 %vm291_vm2, %v3065_v53  ;;  %v2137_v59 = vor.u32 %v2728_v45, %v2134_v46  ;;  %v2387_v45 = vor.u32 %v2780_v32, %v2384_v33  ;;  %v2328_v32 = vld [vmem:[%s3019_s28 + $0x310] sm:$0xf0]  ;;  %v2788_v33 = vld [vmem:[%s3019_s28 + $0x3c4] sm:$0xf] }
  0x69   : > { %832 = vmatpush.bf16.msra.mxu3 %v2157_v47  ;;  %858 = vmatpush.bf16.msra.mxu1 %v2161_v13  ;;  %v2290_v47 = vor.u32 %v2763_v38, %v2289_v37  ;;  %v1176_v30 = vand.u32 %v1153_v19, %v3031_v15  ;;  %v2342_v37 = vld [vmem:[%s3019_s28 + $0x328] sm:$0xf]  ;;  %v2768_v19 = vld [vmem:[%s3019_s28 + $0x31c] sm:$0xf] }
  0x6a   : > { %2203 = vmatmul.msk.bf16.vlgmr.msra.gmra.mxu0 %vm291_vm2, %v3065_v53 }
  0x6b   : > { %1031 = vmatpush.bf16.msrb.mxu0 %v2270_v14  ;;  %2202 = vmatmul.msk.bf16.vlgmr.msra.gmra.mxu2 %vm291_vm2, %v3065_v53  ;;  %v2294_v14 = vor.u32 %v2762_v4, %v2291_v5  ;;  %v2792_v4 = vld [vmem:[%s3019_s28 + $0x3e4] sm:$0xf]  ;;  %v2453_v5 = vld [vmem:[%s3019_s28 + $0x3e8] sm:$0xf0] }
  0x6c   : > { %1005 = vmatpush.bf16.msrb.mxu2 %v2266_v9  ;;  %v2376_v9 = vld [vmem:[%s3019_s28 + $0x370] sm:$0xf0]  ;;  %v2456_v11 = vor.u32 %v2792_v4, %v2453_v5  ;;  %v2477_v5 = vld [vmem:[%s3019_s28 + $0x418] sm:$0xf0] }
  0x6d   : > { %833 = vmatpush.bf16.msra.mxu3 %v2149_v61  ;;  %859 = vmatpush.bf16.msra.mxu1 %v2153_v27  ;;  %v1132_v61 = vunpack.c.l.b16 %v2315_v51  ;;  %v2379_v21 = vor.u32 %v2778_v8, %v2376_v9  ;;  %v2368_v27 = vld [vmem:[%s3019_s28 + $0x360] sm:$0xf0]  ;;  %v2334_v51 = vld [vmem:[%s3019_s28 + $0x318] sm:$0xf]  ;;  %v2798_v4 = vld [vmem:[%s3019_s28 + $0x414] sm:$0xf] }
  0x6e   : > { %v2371_v38 = vor.u32 %v2776_v26, %v2368_v27  ;;  %v2789_v26 = vld [vmem:[%s3019_s28 + $0x3c4] sm:$0xf0] }
  0x6f   : > { %1032 = vmatpush.bf16.msrb.mxu0 %v2262_v28  ;;  %v1152_v13 = vpack.c.b16 %v1132_v61, %v1132_v61  ;;  %v2382_v28 = vld [vmem:[%s3019_s28 + $0x378] sm:$0xf] }
  0x70   : > { %1006 = vmatpush.bf16.msrb.mxu2 %v2258_v23  ;;  %v2773_v23 = vld [vmem:[%s3019_s28 + $0x33c] sm:$0xf0] }
  0x71   : > { %834 = vmatpush.bf16.msra.mxu3 %v2141_v10  ;;  %860 = vmatpush.bf16.msra.mxu1 %v2145_v43  ;;  %v2238_v10 = vor.u32 %v2748_v63, %v2235_v0  ;;  %v1173_v25 = vand.u32 %v1152_v13, %v3031_v15  ;;  %v2351_v34 = vor.u32 %v2773_v23, %v2350_v29  ;;  %v2774_v43 = vld [vmem:[%s3019_s28 + $0x34c] sm:$0xf]  ;;  %v2451_v63 = vld [vmem:[%s3019_s28 + $0x3e0] sm:$0xf]  ;;  %v2793_v0 = vld [vmem:[%s3019_s28 + $0x3e4] sm:$0xf0] }
  0x72   : > { %v2452_v9 = vor.u32 %v2793_v0, %v2451_v63  ;;  %v2791_v13 = vld [vmem:[%s3019_s28 + $0x3d4] sm:$0xf0]  ;;  %v2784_v63 = vld [vmem:[%s3019_s28 + $0x3a4] sm:$0xf]  ;;  %v2421_v0 = vld [vmem:[%s3019_s28 + $0x3a8] sm:$0xf0] }
  0x73   : > { %1033 = vmatpush.bf16.msrb.mxu0 %v2254_v44  ;;  %v2360_v44 = vld [vmem:[%s3019_s28 + $0x350] sm:$0xf0]  ;;  %v2444_v23 = vor.u32 %v2791_v13, %v2443_v12  ;;  %v2783_v12 = vld [vmem:[%s3019_s28 + $0x394] sm:$0xf0] }
  0x74   : > { %1007 = vmatpush.bf16.msrb.mxu2 %v2250_v36  ;;  %v2797_v36 = vld [vmem:[%s3019_s28 + $0x404] sm:$0xf0] }
  0x75   : > { %835 = vmatpush.bf16.msra.mxu3 %v2133_v24  ;;  %861 = vmatpush.bf16.msra.mxu1 %v2137_v59  ;;  %v2230_v24 = vor.u32 %v2746_v16, %v2227_v18  ;;  %v2468_v46 = vor.u32 %v2797_v36, %v2467_v35  ;;  %v2460_v59 = vor.u32 %v2795_v50, %v2459_v49  ;;  %v2318_v16 = vld [vmem:[%s3019_s28 + $0x2f8] sm:$0xf]  ;;  %v2765_v18 = vld [vmem:[%s3019_s28 + $0x2fc] sm:$0xf0]  ;;  %v2429_v49 = vld [vmem:[%s3019_s28 + $0x3b8] sm:$0xf0] }
  0x77   : > { %1034 = vmatpush.bf16.msrb.mxu0 %v2246_v60  ;;  %v3302_v60 = vld [vmem:[%s3019_s28 + $0x420] sm:$0x33] }
  0x78   : > { %836 = vmatmul.bf16.vlgmr.msra.gmra.mxu3 %v3111_v54  ;;  %1008 = vmatpush.bf16.msrb.mxu2 %v2242_v52  ;;  %v2769_v52 = vld [vmem:[%s3019_s28 + $0x31c] sm:$0xf0]  ;;  %v1307_v8 = vunpack.c.l.b16 %v3302_v60  ;;  %v1308_v35 = vunpack.c.h.b16 %v3302_v60 }
  0x79   : > { %1022 = vmatpush.bf16.msrb.mxu3 %v998_v31  ;;  %1048 = vmatpush.bf16.msrb.mxu1 %v1001_v62  ;;  %v2781_v31 = vld [vmem:[%s3019_s28 + $0x37c] sm:$0xf0]  ;;  %v2335_v61 = vor.u32 %v2769_v52, %v2334_v51  ;;  %v2464_v62 = vor.u32 %v2794_v55, %v2461_v56  ;;  %v2501_v51 = vld [vmem:[%s3019_s28 + $0x4b8] sm:$0x33]  ;;  %v2552_v55 = vld [vmem:[%s3019_s28 + $0x488] sm:$0xf] }
  0x7a   : > { %862 = vmatmul.bf16.vlgmr.msra.gmra.mxu1 %v3111_v54  ;;  %v2383_v42 = vor.u32 %v2781_v31, %v2382_v28  ;;  %v1327_v29 = vpack.c.b16 %v1307_v8, %v1307_v8  ;;  %v1328_v50 = vpack.c.b16 %v1308_v35, %v1308_v35  ;;  %v2813_v56 = vld [vmem:[%s3019_s28 + $0x48c] sm:$0xf0]  ;;  %v2814_v8 = vld [vmem:[%s3019_s28 + $0x49c] sm:$0xf] }
  0x7b   : > { %1035 = vmatpush.bf16.msrb.mxu0 %v2238_v10  ;;  %v2653_v35 = vld [vmem:[%s3019_s28 + $0x530] sm:$0xf] }
  0x7c   : > { %1009 = vmatpush.bf16.msrb.mxu2 %v2234_v3  ;;  %v2767_v3 = vld [vmem:[%s3019_s28 + $0x30c] sm:$0xf0]  ;;  %v1348_v31 = vand.u32 %v1327_v29, %v3031_v15  ;;  %v2536_v29 = vld [vmem:[%s3019_s28 + $0x468] sm:$0xf] }
  0x7d   : > { %1023 = vmatpush.bf16.msrb.mxu3 %v2290_v47  ;;  %1049 = vmatpush.bf16.msrb.mxu1 %v2294_v14  ;;  %v2343_v47 = vor.u32 %v2771_v39, %v2342_v37  ;;  %v2327_v10 = vor.u32 %v2767_v3, %v2326_v1  ;;  %v2347_v14 = vor.u32 %v2770_v6, %v2344_v7  ;;  %v2475_v37 = vld [vmem:[%s3019_s28 + $0x410] sm:$0xf]  ;;  %v2560_v39 = vld [vmem:[%s3019_s28 + $0x498] sm:$0xf]  ;;  %v1483_v1 = vunpack.c.h.b16 %v2501_v51  ;;  %v2811_v7 = vld [vmem:[%s3019_s28 + $0x47c] sm:$0xf0] }
  0x7e   : > { %v2544_v6 = vld [vmem:[%s3019_s28 + $0x478] sm:$0xf] }
  0x7f   : > { %1036 = vmatpush.bf16.msrb.mxu0 %v2230_v24  ;;  %v2319_v24 = vor.u32 %v2765_v18, %v2318_v16  ;;  %v2782_v16 = vld [vmem:[%s3019_s28 + $0x394] sm:$0xf]  ;;  %v2413_v18 = vld [vmem:[%s3019_s28 + $0x398] sm:$0xf0] }
  0x80   : > { %1010 = vmatpush.bf16.msrb.mxu2 %v2226_v22  ;;  %v2445_v22 = vld [vmem:[%s3019_s28 + $0x3d8] sm:$0xf0] }
  0x81   : > { %1178 = vmatpush.bf16.msra.mxu3 %v2375_v17  ;;  %1204 = vmatpush.bf16.msra.mxu1 %v2379_v21  ;;  %v2363_v17 = vor.u32 %v2774_v43, %v2360_v44  ;;  %v2790_v21 = vld [vmem:[%s3019_s28 + $0x3d4] sm:$0xf] }
  0x82   : > { %1037 = vmatmul.bf16.vlgmr.msrb.gmra.mxu0 %v3111_v54  ;;  %v2448_v28 = vor.u32 %v2790_v21, %v2445_v22 }
  0x83   : > { %1223 = vmatpush.bf16.msra.mxu0 %v1176_v30  ;;  %1011 = vmatmul.bf16.vlgmr.msrb.gmra.mxu2 %v3111_v54  ;;  %v2766_v30 = vld [vmem:[%s3019_s28 + $0x30c] sm:$0xf] }
  0x84   : > { %1197 = vmatpush.bf16.msra.mxu2 %v1173_v25  ;;  %v2435_v25 = vld [vmem:[%s3019_s28 + $0x3c0] sm:$0xf]  ;;  %v2331_v43 = vor.u32 %v2766_v30, %v2328_v32  ;;  %v2816_v32 = vld [vmem:[%s3019_s28 + $0x4ac] sm:$0xf] }
  0x85   : > { %1179 = vmatpush.bf16.msra.mxu3 %v2367_v2  ;;  %1205 = vmatpush.bf16.msra.mxu1 %v2371_v38  ;;  %v2355_v2 = vor.u32 %v2772_v57, %v2352_v58  ;;  %v2436_v36 = vor.u32 %v2789_v26, %v2435_v25  ;;  %v2799_v38 = vld [vmem:[%s3019_s28 + $0x414] sm:$0xf0]  ;;  %v2419_v57 = vld [vmem:[%s3019_s28 + $0x3a0] sm:$0xf]  ;;  %v2785_v58 = vld [vmem:[%s3019_s28 + $0x3a4] sm:$0xf0] }
  0x86   : > { %v2420_v3 = vor.u32 %v2785_v58, %v2419_v57  ;;  %v2812_v26 = vld [vmem:[%s3019_s28 + $0x48c] sm:$0xf]  ;;  %v2538_v58 = vld [vmem:[%s3019_s28 + $0x470] sm:$0xf0] }
  0x87   : > { %1224 = vmatpush.bf16.msra.mxu0 %v2387_v45  ;;  %v2764_v45 = vld [vmem:[%s3019_s28 + $0x2fc] sm:$0xf]  ;;  %v2808_v57 = vld [vmem:[%s3019_s28 + $0x46c] sm:$0xf] }
  0x88   : > { %2295 = vmatmul.msk.bf16.vlgmr.msrb.gmra.mxu3 %vm291_vm2, %v3065_v53  ;;  %1198 = vmatpush.bf16.msra.mxu2 %v2383_v42  ;;  %v2787_v42 = vld [vmem:[%s3019_s28 + $0x3b4] sm:$0xf0] }
  0x89   : > { %1180 = vmatpush.bf16.msra.mxu3 %v2359_v20  ;;  %1206 = vmatpush.bf16.msra.mxu1 %v2363_v17  ;;  %v2336_v20 = vld [vmem:[%s3019_s28 + $0x320] sm:$0xf0]  ;;  %v2561_v17 = vor.u32 %v2815_v40, %v2560_v39  ;;  %v2428_v52 = vor.u32 %v2787_v42, %v2427_v41  ;;  %v2807_v39 = vld [vmem:[%s3019_s28 + $0x45c] sm:$0xf0]  ;;  %v2832_v40 = vld [vmem:[%s3019_s28 + $0x534] sm:$0xf] }
  0x8a   : > { %2296 = vmatmul.msk.bf16.vlgmr.msrb.gmra.mxu1 %vm291_vm2, %v3065_v53  ;;  %v2339_v27 = vor.u32 %v2768_v19, %v2336_v20  ;;  %v1503_v19 = vpack.c.b16 %v1483_v1, %v1483_v1  ;;  %v2545_v20 = vor.u32 %v2811_v7, %v2544_v6  ;;  %v2655_v41 = vld [vmem:[%s3019_s28 + $0x538] sm:$0xf0]  ;;  %v2512_v1 = vld [vmem:[%s3019_s28 + $0x438] sm:$0xf]  ;;  %v2530_v7 = vld [vmem:[%s3019_s28 + $0x460] sm:$0xf0] }
  0x8b   : > { %1379 = vmatpush.bf16.msrb.mxu0 %v2472_v48  ;;  %v2786_v48 = vld [vmem:[%s3019_s28 + $0x3b4] sm:$0xf]  ;;  %v2806_v6 = vld [vmem:[%s3019_s28 + $0x45c] sm:$0xf] }
  0x8c   : > { %1353 = vmatpush.bf16.msrb.mxu2 %v2468_v46  ;;  %v2320_v46 = vld [vmem:[%s3019_s28 + $0x300] sm:$0xf0]  ;;  %v2432_v60 = vor.u32 %v2786_v48, %v2429_v49  ;;  %v1526_v30 = vand.u32 %v1503_v19, %v3031_v15  ;;  %v2658_v48 = vor.u32 %v2832_v40, %v2655_v41  ;;  %v2645_v49 = vld [vmem:[%s3019_s28 + $0x520] sm:$0xf]  ;;  %v2801_v19 = vld [vmem:[%s3019_s28 + $0x42c] sm:$0xf0] }
  0x8d   : > { %1181 = vmatpush.bf16.msra.mxu3 %v2351_v34  ;;  %1207 = vmatpush.bf16.msra.mxu1 %v2355_v2  ;;  %v2437_v34 = vld [vmem:[%s3019_s28 + $0x3c8] sm:$0xf0]  ;;  %v2553_v2 = vor.u32 %v2813_v56, %v2552_v55  ;;  %v2830_v55 = vld [vmem:[%s3019_s28 + $0x524] sm:$0xf]  ;;  %v2661_v40 = vld [vmem:[%s3019_s28 + $0x540] sm:$0xf] }
  0x8e   : > { %v2440_v44 = vor.u32 %v2788_v33, %v2437_v34  ;;  %v2570_v33 = vld [vmem:[%s3019_s28 + $0x4b0] sm:$0xf0]  ;;  %v2647_v56 = vld [vmem:[%s3019_s28 + $0x528] sm:$0xf0]  ;;  %v2835_v41 = vld [vmem:[%s3019_s28 + $0x544] sm:$0xf0] }
  0x8f   : > { %1380 = vmatpush.bf16.msrb.mxu0 %v2464_v62  ;;  %v1351_v62 = vand.u32 %v1328_v50, %v3031_v15  ;;  %v2831_v50 = vld [vmem:[%s3019_s28 + $0x524] sm:$0xf0] }
  0x90   : > { %1354 = vmatpush.bf16.msrb.mxu2 %v2460_v59  ;;  %v2323_v59 = vor.u32 %v2764_v45, %v2320_v46  ;;  %v2573_v45 = vor.u32 %v2816_v32, %v2570_v33  ;;  %v2802_v32 = vld [vmem:[%s3019_s28 + $0x43c] sm:$0xf]  ;;  %v2514_v33 = vld [vmem:[%s3019_s28 + $0x440] sm:$0xf0] }
  0x91   : > { %1182 = vmatpush.bf16.msra.mxu3 %v2343_v47  ;;  %1208 = vmatpush.bf16.msra.mxu1 %v2347_v14  ;;  %v2476_v47 = vor.u32 %v2799_v38, %v2475_v37  ;;  %v2480_v14 = vor.u32 %v2798_v4, %v2477_v5  ;;  %v2528_v37 = vld [vmem:[%s3019_s28 + $0x458] sm:$0xf]  ;;  %v2828_v4 = vld [vmem:[%s3019_s28 + $0x514] sm:$0xf]  ;;  %v2639_v5 = vld [vmem:[%s3019_s28 + $0x518] sm:$0xf0] }
  0x92   : > { %2389 = vmatmul.msk.bf16.vlgmr.msra.gmra.mxu0 %vm291_vm2, %v3065_v53 }
  0x93   : > { %1381 = vmatpush.bf16.msrb.mxu0 %v2456_v11  ;;  %2388 = vmatmul.msk.bf16.vlgmr.msra.gmra.mxu2 %vm291_vm2, %v3065_v53  ;;  %v2411_v11 = vld [vmem:[%s3019_s28 + $0x390] sm:$0xf] }
  0x94   : > { %1355 = vmatpush.bf16.msrb.mxu2 %v2452_v9  ;;  %v2562_v9 = vld [vmem:[%s3019_s28 + $0x4a0] sm:$0xf0]  ;;  %v2412_v22 = vor.u32 %v2783_v12, %v2411_v11  ;;  %v2642_v12 = vor.u32 %v2828_v4, %v2639_v5  ;;  %v2597_v4 = vld [vmem:[%s3019_s28 + $0x4c0] sm:$0xf]  ;;  %v2819_v5 = vld [vmem:[%s3019_s28 + $0x4c4] sm:$0xf0] }
  0x95   : > { %1183 = vmatpush.bf16.msra.mxu3 %v2335_v61  ;;  %1209 = vmatpush.bf16.msra.mxu1 %v2339_v27  ;;  %v1482_v61 = vunpack.c.l.b16 %v2501_v51  ;;  %v2565_v21 = vor.u32 %v2814_v8, %v2562_v9  ;;  %v2554_v27 = vld [vmem:[%s3019_s28 + $0x490] sm:$0xf0]  ;;  %v2520_v51 = vld [vmem:[%s3019_s28 + $0x448] sm:$0xf] }
  0x96   : > { %v2557_v38 = vor.u32 %v2812_v26, %v2554_v27  ;;  %v2621_v27 = vld [vmem:[%s3019_s28 + $0x4f0] sm:$0xf] }
  0x97   : > { %1382 = vmatpush.bf16.msrb.mxu0 %v2448_v28  ;;  %v1502_v13 = vpack.c.b16 %v1482_v61, %v1482_v61  ;;  %v2568_v28 = vld [vmem:[%s3019_s28 + $0x4a8] sm:$0xf] }
  0x98   : > { %1356 = vmatpush.bf16.msrb.mxu2 %v2444_v23  ;;  %v2809_v23 = vld [vmem:[%s3019_s28 + $0x46c] sm:$0xf0] }
  0x99   : > { %1184 = vmatpush.bf16.msra.mxu3 %v2327_v10  ;;  %1210 = vmatpush.bf16.msra.mxu1 %v2331_v43  ;;  %v2424_v10 = vor.u32 %v2784_v63, %v2421_v0  ;;  %v1523_v25 = vand.u32 %v1502_v13, %v3031_v15  ;;  %v2537_v34 = vor.u32 %v2809_v23, %v2536_v29  ;;  %v2810_v43 = vld [vmem:[%s3019_s28 + $0x47c] sm:$0xf]  ;;  %v2637_v63 = vld [vmem:[%s3019_s28 + $0x510] sm:$0xf]  ;;  %v2829_v0 = vld [vmem:[%s3019_s28 + $0x514] sm:$0xf0] }
  0x9a   : > { %v2638_v9 = vor.u32 %v2829_v0, %v2637_v63  ;;  %v2629_v13 = vld [vmem:[%s3019_s28 + $0x500] sm:$0xf]  ;;  %v2631_v29 = vld [vmem:[%s3019_s28 + $0x508] sm:$0xf0]  ;;  %v2607_v63 = vld [vmem:[%s3019_s28 + $0x4d8] sm:$0xf0] }
  0x9b   : > { %1383 = vmatpush.bf16.msrb.mxu0 %v2440_v44  ;;  %v2546_v44 = vld [vmem:[%s3019_s28 + $0x480] sm:$0xf0] }
  0x9c   : > { %1357 = vmatpush.bf16.msrb.mxu2 %v2436_v36  ;;  %v2833_v36 = vld [vmem:[%s3019_s28 + $0x534] sm:$0xf0] }
  0x9d   : > { %1185 = vmatpush.bf16.msra.mxu3 %v2319_v24  ;;  %1211 = vmatpush.bf16.msra.mxu1 %v2323_v59  ;;  %v2416_v24 = vor.u32 %v2782_v16, %v2413_v18  ;;  %v2654_v46 = vor.u32 %v2833_v36, %v2653_v35  ;;  %v2646_v59 = vor.u32 %v2831_v50, %v2645_v49  ;;  %v2504_v18 = vld [vmem:[%s3019_s28 + $0x428] sm:$0xf]  ;;  %v2623_v35 = vld [vmem:[%s3019_s28 + $0x4f8] sm:$0xf0]  ;;  %v2615_v49 = vld [vmem:[%s3019_s28 + $0x4e8] sm:$0xf0] }
  0x9e   : > { %v2533_v16 = vor.u32 %v2806_v6, %v2530_v7  ;;  %v2505_v26 = vor.u32 %v2801_v19, %v2504_v18 }
  0x9f   : > { %1384 = vmatpush.bf16.msrb.mxu0 %v2432_v60  ;;  %v3396_v60 = vld [vmem:[%s3019_s28 + $0x550] sm:$0x33] }
  0xa0   : > { %1186 = vmatmul.bf16.vlgmr.msra.gmra.mxu3 %v3111_v54  ;;  %1358 = vmatpush.bf16.msrb.mxu2 %v2428_v52  ;;  %v2805_v52 = vld [vmem:[%s3019_s28 + $0x44c] sm:$0xf0]  ;;  %v1657_v8 = vunpack.c.l.b16 %v3396_v60 }
  0xa1   : > { %1372 = vmatpush.bf16.msrb.mxu3 %v1348_v31  ;;  %1398 = vmatpush.bf16.msrb.mxu1 %v1351_v62  ;;  %v2817_v31 = vld [vmem:[%s3019_s28 + $0x4ac] sm:$0xf0]  ;;  %v2521_v61 = vor.u32 %v2805_v52, %v2520_v51  ;;  %v2650_v62 = vor.u32 %v2830_v55, %v2647_v56  ;;  %v2662_v51 = vor.u32 %v2835_v41, %v2661_v40  ;;  %v1757_v52 = vld [vmem:[%s3502_s1] sm:$0xff] }
  0xa2   : > { %1212 = vmatmul.bf16.vlgmr.msra.gmra.mxu1 %v3111_v54  ;;  %v2569_v42 = vor.u32 %v2817_v31, %v2568_v28  ;;  %v1677_v23 = vpack.c.b16 %v1657_v8, %v1657_v8  ;;  %v2825_v28 = vld [vmem:[%s3019_s28 + $0x4f4] sm:$0xf0]  ;;  %v2605_v56 = vld [vmem:[%s3019_s28 + $0x4d0] sm:$0xf]  ;;  %v2599_v8 = vld [vmem:[%s3019_s28 + $0x4c8] sm:$0xf0] }
  0xa3   : > { %1385 = vmatpush.bf16.msrb.mxu0 %v2424_v10 }
  0xa4   : > { %1359 = vmatpush.bf16.msrb.mxu2 %v2420_v3  ;;  %v2803_v3 = vld [vmem:[%s3019_s28 + $0x43c] sm:$0xf0]  ;;  %v1698_v36 = vand.u32 %v1677_v23, %v3031_v15 }
  0xa5   : > { %1373 = vmatpush.bf16.msrb.mxu3 %v2476_v47  ;;  %1399 = vmatpush.bf16.msrb.mxu1 %v2480_v14  ;;  %v2529_v47 = vor.u32 %v2807_v39, %v2528_v37  ;;  %v2513_v11 = vor.u32 %v2803_v3, %v2512_v1  ;;  %v2827_v14 = vld [vmem:[%s3019_s28 + $0x504] sm:$0xf0]  ;;  %v1658_v37 = vunpack.c.h.b16 %v3396_v60  ;;  %v2834_v1 = vld [vmem:[%s3019_s28 + $0x544] sm:$0xf] }
  0xa7   : > { %1386 = vmatpush.bf16.msrb.mxu0 %v2416_v24  ;;  %v3407_v10 = vpop.f32.mrf.mxu1  ;;  %v2630_v24 = vor.u32 %v2827_v14, %v2629_v13  ;;  %v1678_v50 = vpack.c.b16 %v1658_v37, %v1658_v37 }
  0xa8   : > { %1360 = vmatpush.bf16.msrb.mxu2 %v2412_v22  ;;  %v2826_v22 = vld [vmem:[%s3019_s28 + $0x504] sm:$0xf] }
  0xa9   : > { %1528 = vmatpush.bf16.msra.mxu3 %v2561_v17  ;;  %1554 = vmatpush.bf16.msra.mxu1 %v2565_v21  ;;  %v2549_v17 = vor.u32 %v2810_v43, %v2546_v44  ;;  %v2522_v21 = vld [vmem:[%s3019_s28 + $0x450] sm:$0xf0]  ;;  %v2634_v31 = vor.u32 %v2826_v22, %v2631_v29  ;;  %v2823_v43 = vld [vmem:[%s3019_s28 + $0x4e4] sm:$0xf0]  ;;  %v2517_v44 = vor.u32 %v2802_v32, %v2514_v33 }
  0xaa   : > { %1387 = vmatmul.bf16.vlgmr.msrb.gmra.mxu0 %v3111_v54 }
  0xab   : > { %1573 = vmatpush.bf16.msra.mxu0 %v1526_v30  ;;  %1361 = vmatmul.bf16.vlgmr.msrb.gmra.mxu2 %v3111_v54 }
  0xac   : > { %1547 = vmatpush.bf16.msra.mxu2 %v1523_v25  ;;  %v3419_v25 = vpop.f32.mrf.mxu3 }
  0xad   : > { %1529 = vmatpush.bf16.msra.mxu3 %v2553_v2  ;;  %1555 = vmatpush.bf16.msra.mxu1 %v2557_v38  ;;  %v2541_v2 = vor.u32 %v2808_v57, %v2538_v58  ;;  %v2622_v38 = vor.u32 %v2825_v28, %v2621_v27  ;;  %v2821_v57 = vld [vmem:[%s3019_s28 + $0x4d4] sm:$0xf0]  ;;  %v2945_v58 = vmov 0  }
  0xae   : > { %2879 = vset.pattern.permute.xlu0 %v2945_v58  ;;  %v2606_v0 = vor.u32 %v2821_v57, %v2605_v56 }
  0xaf   : > { %1574 = vmatpush.bf16.msra.mxu0 %v2573_v45  ;;  %v329_v39 = vpop.f32.mrf.mxu1  ;;  %1760 = vperm.xlu0 %2879, %v1757_v52  }
  0xb0   : > { %2481 = vmatmul.msk.bf16.vlgmr.msrb.gmra.mxu3 %vm291_vm2, %v3065_v53  ;;  %1548 = vmatpush.bf16.msra.mxu2 %v2569_v42  ;;  %v2613_v42 = vld [vmem:[%s3019_s28 + $0x4e0] sm:$0xf] }
  0xb1   : > { %1530 = vmatpush.bf16.msra.mxu3 %v2545_v20  ;;  %1556 = vmatpush.bf16.msra.mxu1 %v2549_v17  ;;  %v2804_v20 = vld [vmem:[%s3019_s28 + $0x44c] sm:$0xf]  ;;  %v2614_v17 = vor.u32 %v2823_v43, %v2613_v42 }
  0xb2   : > { %2482 = vmatmul.msk.bf16.vlgmr.msrb.gmra.mxu1 %vm291_vm2, %v3065_v53  ;;  %v2525_v30 = vor.u32 %v2804_v20, %v2522_v21 }
  0xb3   : > { %1729 = vmatpush.bf16.msrb.mxu0 %v2658_v48  ;;  %v2822_v48 = vld [vmem:[%s3019_s28 + $0x4e4] sm:$0xf] }
  0xb4   : > { %1703 = vmatpush.bf16.msrb.mxu2 %v2654_v46  ;;  %v2800_v46 = vld [vmem:[%s3019_s28 + $0x42c] sm:$0xf]  ;;  %v355_v55 = vpop.f32.mrf.mxu3  ;;  %v2618_v60 = vor.u32 %v2822_v48, %v2615_v49 }
  0xb5   : > { %1531 = vmatpush.bf16.msra.mxu3 %v2537_v34  ;;  %1557 = vmatpush.bf16.msra.mxu1 %v2541_v2  ;;  %v2824_v34 = vld [vmem:[%s3019_s28 + $0x4f4] sm:$0xf]  ;;  %v2663_v2 = vld [vmem:[%s3019_s28 + $0x548] sm:$0xf0] }
  0xb6   : > { %v2626_v45 = vor.u32 %v2824_v34, %v2623_v35 }
  0xb7   : > { %1730 = vmatpush.bf16.msrb.mxu0 %v2650_v62  ;;  %v2820_v62 = vld [vmem:[%s3019_s28 + $0x4d4] sm:$0xf]  ;;  %v314_v3 = vpop.f32.mrf.mxu0 }
  0xb8   : > { %1704 = vmatpush.bf16.msrb.mxu2 %v2646_v59  ;;  %v328_v6 = vadd.f32 %v3407_v10, %v314_v3  ;;  %v2610_v7 = vor.u32 %v2820_v62, %v2607_v63 }
  0xb9   : > { %1532 = vmatpush.bf16.msra.mxu3 %v2529_v47  ;;  %1558 = vmatpush.bf16.msra.mxu1 %v2533_v16  ;;  %v2506_v47 = vld [vmem:[%s3019_s28 + $0x430] sm:$0xf0] }
  0xba   : > { %2575 = vmatmul.msk.bf16.vlgmr.msra.gmra.mxu0 %vm291_vm2, %v3065_v53  ;;  %v2509_v59 = vor.u32 %v2800_v46, %v2506_v47 }
  0xbb   : > { %1731 = vmatpush.bf16.msrb.mxu0 %v2642_v12  ;;  %2574 = vmatmul.msk.bf16.vlgmr.msra.gmra.mxu2 %vm291_vm2, %v3065_v53 }
  0xbc   : > { %1705 = vmatpush.bf16.msrb.mxu2 %v2638_v9  ;;  %v2666_v9 = vor.u32 %v2834_v1, %v2663_v2  ;;  %v500_v12 = vpop.f32.mrf.mxu3 }
  0xbd   : > { %1533 = vmatpush.bf16.msra.mxu3 %v2521_v61  ;;  %1559 = vmatpush.bf16.msra.mxu1 %v2525_v30  ;;  %v1701_v61 = vand.u32 %v1678_v50, %v3031_v15  ;;  %v2818_v15 = vld [vmem:[%s3019_s28 + $0x4c4] sm:$0xf]  ;;  %s2900_s28 = scalar_lea.hbm %s3504_s3, 32 }
  0xbe   : > { %v2602_v13 = vor.u32 %v2818_v15, %v2599_v8  ;;  %v340_v14 = vpop.f32.mrf.mxu2  ;;  %p2902_p1 = scmp.lt.s32.totalorder %s2900_s28, %s2896_s25 }
  0xbf   : > { %1732 = vmatpush.bf16.msrb.mxu0 %v2634_v31  ;;  %v354_v16 = vadd.f32 %v3419_v25, %v340_v14  ;;  %v316_v18 = vpop.f32.mrf.mxu0 }
  0xc0   : > { %1706 = vmatpush.bf16.msrb.mxu2 %v2630_v24  ;;  %p2903_p2 = por %p2902_p1, %p2901_p0 }
  0xc1   : > { %1534 = vmatpush.bf16.msra.mxu3 %v2513_v11  ;;  %1560 = vmatpush.bf16.msra.mxu1 %v2517_v44  ;;  %v2598_v11 = vor.u32 %v2819_v5, %v2597_v4 }
  0xc2   : > { %p2904_p3 = pnand %p2903_p2, %p2899_p13 }
  0xc3   : > { %1733 = vmatpush.bf16.msrb.mxu0 %v2626_v45 }
  0xc4   : > { %1707 = vmatpush.bf16.msrb.mxu2 %v2622_v38  ;;  %v502_v20 = vpop.f32.mrf.mxu3 }
  0xc5   : > { %1535 = vmatpush.bf16.msra.mxu3 %v2505_v26  ;;  %1561 = vmatpush.bf16.msra.mxu1 %v2509_v59  ;;  %v487_v10 = vpop.f32.mrf.mxu1 }
  0xc6   : > { %v501_v19 = vadd.f32 %v500_v12, %v487_v10  ;;  %v342_v22 = vpop.f32.mrf.mxu2 }
  0xc7   : > { %1734 = vmatpush.bf16.msrb.mxu0 %v2618_v60 }
  0xc8   : > { %1536 = vmatmul.bf16.vlgmr.msra.gmra.mxu3 %v3111_v54  ;;  %1708 = vmatpush.bf16.msrb.mxu2 %v2614_v17  ;;  %v530_v21 = vmax.f32 %v328_v6, %v501_v19 }
  0xc9   : > { %1722 = vmatpush.bf16.msrb.mxu3 %v1698_v36  ;;  %1748 = vmatpush.bf16.msrb.mxu1 %v1701_v61 }
  0xca   : > { %1562 = vmatmul.bf16.vlgmr.msra.gmra.mxu1 %v3111_v54 }
  0xcb   : > { %1735 = vmatpush.bf16.msrb.mxu0 %v2610_v7 }
  0xcc   : > { %1709 = vmatpush.bf16.msrb.mxu2 %v2606_v0 }
  0xcd   : > { %1723 = vmatpush.bf16.msrb.mxu3 %v2662_v51  ;;  %1749 = vmatpush.bf16.msrb.mxu1 %v2666_v9  ;;  %v489_v29 = vpop.f32.mrf.mxu1 }
  0xcf   : > { %1736 = vmatpush.bf16.msrb.mxu0 %v2602_v13 }
  0xd0   : > { %1710 = vmatpush.bf16.msrb.mxu2 %v2598_v11 }
  0xd2   : > { %1737 = vmatmul.bf16.vlgmr.msrb.gmra.mxu0 %v3111_v54 }
  0xd3   : > { %1711 = vmatmul.bf16.vlgmr.msrb.gmra.mxu2 %v3111_v54  ;;  %v513_v23 = vpop.f32.mrf.mxu3 }
  0xd5   : > { %v675_v24 = vpop.f32.mrf.mxu1 }
  0xd7   : > { %v688_v26 = vpop.f32.mrf.mxu0 }
  0xd8   : > { %2667 = vmatmul.msk.bf16.vlgmr.msrb.gmra.mxu3 %vm291_vm2, %v3065_v53 }
  0xda   : > { %2668 = vmatmul.msk.bf16.vlgmr.msrb.gmra.mxu1 %vm291_vm2, %v3065_v53 }
  0xdb   : > { %v515_v25 = vpop.f32.mrf.mxu3 }
  0xdd   : > { %v677_v27 = vpop.f32.mrf.mxu1 }
  0xde   : > { %v662_v28 = vpop.f32.mrf.mxu2 }
  0xdf   : > { %v676_v30 = vadd.f32 %v675_v24, %v662_v28  ;;  %v690_v54 = vpop.f32.mrf.mxu0 }
  0xe1   : > { %v705_v33 = vmax.f32 %v530_v21, %v676_v30 }
  0xe3   : > { %v526_v31 = vpop.f32.mrf.mxu3 }
  0xe4   : > { %v527_v32 = vadd.f32 %v526_v31, %v513_v23 }
  0xe5   : > { %v701_v35 = vpop.f32.mrf.mxu1 }
  0xe6   : > { %v531_v34 = vmax.f32 %v354_v16, %v527_v32  ;;  %v702_v36 = vadd.f32 %v701_v35, %v688_v26  ;;  %v664_v37 = vpop.f32.mrf.mxu2 }
  0xe7   : > { %v876_v40 = vpop.f32.mrf.mxu0 }
  0xe8   : > { %v706_v38 = vmax.f32 %v531_v34, %v702_v36 }
  0xeb   : > { %v528_v39 = vpop.f32.mrf.mxu3 }
  0xed   : > { %v703_v41 = vpop.f32.mrf.mxu1 }
  0xee   : > { %v850_v53 = vpop.f32.mrf.mxu2 }
  0xef   : > { %v878_v44 = vpop.f32.mrf.mxu0 }
  0xf6   : > { %v852_v48 = vpop.f32.mrf.mxu2 }
  0xf7   : > { %v863_v46 = vpop.f32.mrf.mxu1 }
  0xf8   : > { %v877_v47 = vadd.f32 %v876_v40, %v863_v46 }
  0xfa   : > { %v881_v49 = vmax.f32 %v706_v38, %v877_v47 }
  0xfb   : > { %v837_v42 = vpop.f32.mrf.mxu3 }
  0xfc   : > { %v851_v43 = vadd.f32 %v850_v53, %v837_v42 }
  0xfe   : > { %v880_v45 = vmax.f32 %v705_v33, %v851_v43 }
  0xff   : > { %v865_v51 = vpop.f32.mrf.mxu1  ;;  %v1038_v17 = vpop.f32.mrf.mxu0 }
 0x103   : > { %v839_v50 = vpop.f32.mrf.mxu3 }
 0x106   : > { %v1012_v52 = vpop.f32.mrf.mxu2 }
 0x107   : > { %v1051_v56 = vpop.f32.mrf.mxu1  ;;  %v1040_v57 = vpop.f32.mrf.mxu0 }
 0x108   : > { %v1052_v58 = vadd.f32 %v1051_v56, %v1038_v17 }
 0x10a   : > { %v1056_v59 = vmax.f32 %v881_v49, %v1052_v58 }
 0x10b   : > { %v1025_v55 = vpop.f32.mrf.mxu3 }
 0x10c   : > { %v1026_v22 = vadd.f32 %v1025_v55, %v1012_v52 }
 0x10e   : > { %v1014_v60 = vpop.f32.mrf.mxu2  ;;  %v1055_v24 = vmax.f32 %v880_v45, %v1026_v22 }
 0x10f   : > { %v1053_v62 = vpop.f32.mrf.mxu1  ;;  %v1226_v63 = vpop.f32.mrf.mxu0 }
 0x113   : > { %v1027_v61 = vpop.f32.mrf.mxu3 }
 0x116   : > { %v1200_v0 = vpop.f32.mrf.mxu2 }
 0x117   : > { %v1228_v2 = vpop.f32.mrf.mxu0 }
 0x11e   : > { %v1202_v4 = vpop.f32.mrf.mxu2 }
 0x11f   : > { %v1213_v3 = vpop.f32.mrf.mxu1 }
 0x120   : > { %v1227_v28 = vadd.f32 %v1226_v63, %v1213_v3 }
 0x121   : > { %v1761_v40 = vpop.permute.xlu0 %1760 }
 0x122   : > { %v1231_v54 = vmax.f32 %v1056_v59, %v1227_v28 }
 0x123   : > { %v1187_v1 = vpop.f32.mrf.mxu3 }
 0x124   : > { %v1201_v23 = vadd.f32 %v1200_v0, %v1187_v1 }
 0x126   : > { %v1230_v30 = vmax.f32 %v1055_v24, %v1201_v23 }
 0x127   : > { %v1215_v6 = vpop.f32.mrf.mxu1  ;;  %v1388_v7 = vpop.f32.mrf.mxu0 }
 0x12b   : > { %v1189_v5 = vpop.f32.mrf.mxu3 }
 0x12e   : > { %v1362_v15 = vpop.f32.mrf.mxu2 }
 0x12f   : > { %v1401_v9 = vpop.f32.mrf.mxu1  ;;  %v1390_v11 = vpop.f32.mrf.mxu0 }
 0x130   : > { %v1402_v32 = vadd.f32 %v1401_v9, %v1388_v7 }
 0x132   : > { %v1406_v39 = vmax.f32 %v1231_v54, %v1402_v32 }
 0x133   : > { %v1375_v8 = vpop.f32.mrf.mxu3 }
 0x134   : > { %v1376_v25 = vadd.f32 %v1375_v8, %v1362_v15 }
 0x136   : > { %v1364_v12 = vpop.f32.mrf.mxu2  ;;  %v1405_v33 = vmax.f32 %v1230_v30, %v1376_v25 }
 0x137   : > { %v1403_v14 = vpop.f32.mrf.mxu1  ;;  %v1576_v16 = vpop.f32.mrf.mxu0 }
 0x13b   : > { %v1377_v13 = vpop.f32.mrf.mxu3 }
 0x13e   : > { %v1550_v18 = vpop.f32.mrf.mxu2 }
 0x13f   : > { %v1578_v19 = vpop.f32.mrf.mxu0 }
 0x146   : > { %v1552_v21 = vpop.f32.mrf.mxu2 }
 0x147   : > { %v1563_v20 = vpop.f32.mrf.mxu1 }
 0x148   : > { %v1577_v35 = vadd.f32 %v1576_v16, %v1563_v20 }
 0x14a   : > { %v1581_v43 = vmax.f32 %v1406_v39, %v1577_v35 }
 0x14b   : > { %v1537_v10 = vpop.f32.mrf.mxu3 }
 0x14c   : > { %v1551_v31 = vadd.f32 %v1550_v18, %v1537_v10 }
 0x14e   : > { %v1580_v37 = vmax.f32 %v1405_v33, %v1551_v31 }
 0x14f   : > { %v1565_v26 = vpop.f32.mrf.mxu1  ;;  %v1738_v27 = vpop.f32.mrf.mxu0 }
 0x153   : > { %v1539_v29 = vpop.f32.mrf.mxu3 }
 0x156   : > { %v1712_v34 = vpop.f32.mrf.mxu2 }
 0x157   : > { %v1740_v41 = vpop.f32.mrf.mxu0  ;;  %v1751_v53 = vpop.f32.mrf.mxu1 }
 0x158   : > { %v1752_v44 = vadd.f32 %v1751_v53, %v1738_v27 }
 0x15a   : > { %v1756_v46 = vmax.f32 %v1581_v43, %v1752_v44 }
 0x15b   : > { %v1725_v36 = vpop.f32.mrf.mxu3 }
 0x15c   : > { %v1726_v38 = vadd.f32 %v1725_v36, %v1712_v34  ;;  %v1764_v49 = vadd.f32 %v1761_v40, %v1756_v46 }
 0x15e   : > { %v1755_v42 = vmax.f32 %v1580_v37, %v1726_v38  ;;  %v1714_v48 = vpop.f32.mrf.mxu2  ;;  %v1766_v51 = vmax.f32 %v1764_v49, 0.0 }
 0x15f   : > { %v1753_v17 = vpop.f32.mrf.mxu1 }
 0x160   : > { %v1763_v45 = vadd.f32 %v1761_v40, %v1755_v42  ;;  %1768 = vst [vmem:[%s163_s17 + $0x8] sm:$0xff] %v1766_v51 }
 0x162   : > { %v1765_v47 = vmax.f32 %v1763_v45, 0.0 }
 0x163   : > { %v1727_v50 = vpop.f32.mrf.mxu3 }
 0x164   : > { %1767 = vst [vmem:[%s163_s17] sm:$0xff] %v1765_v47 }
 0x165   : > { %2907 = shalt.err (!%p2904_p3)
}
 0x166   : > { %2838 = dma.vmem_to_hbm [thread:$0]  (%p3004_p5), %s1784_s19, 256, %s1786_s16, %s1770_s20  }
 0x167 PF: > { %p2844_p4 = scmp.ge.s32.totalorder %s2942_s15, 2  ;;  %s1797_s4 = sand.u32 1, %s2930_s12  }
 0x168   : > { %s1798_s5 = scalar_lea.sflag [#allocation3], %s1797_s4 }
 0x169   : > { %p2841_p7 = pnand %p2844_p4, %p3008_p6 }
 0x16b   : > { %p2842_p8 = pneg %p2841_p7 }
 0x16d   : > { %2925 = dma.done.wait (%p2842_p8), %s1798_s5, 256  }
 0x16e   : > { %2927 = vsyncadd (%p2842_p8), %s1798_s5, 4294967040  ;;  %p13_p9 = scmp.ge.s32.totalorder %s2991_s18, 4   ;;  %s3507_s12 = smov %s2934_s13 }
 0x16f   : > { %s3508_s13 = smov %s2938_s14  ;;  %s3509_s14 = smov %s3002_s21 }
 0x170   : > { %s3510_s15 = smov %s2991_s18  ;;  %15 = sbr.rel (!%p13_p9) target bundleno = 3 (0x3), region = 75 }
 0x175   :  { %1804 = vsyncpa [#allocation3], 1 }
 0x176   :  { %1806 = vsyncpa [#allocation3 + $0x1], 1 }

</bundles_post_ra>
